<compile_context>
chip_gen: v7x
topology: tpu7x:2x2x1
jax: 0.10.0
libtpu: 0.0.40
codegen_flags: <defaults>
</compile_context>

<pallas_src>
import functools

import jax
import jax.numpy as jnp
import numpy as np
from jax.experimental import pallas as pl
from jax.experimental.pallas import tpu as pltpu


# ----------------------------------------------------------------------------
# Pallas kernel: `block_b` windows per grid step, all heads batched.
# ----------------------------------------------------------------------------
def _cross_window_attn_kernel(*refs, num_heads, head_dim, scale, has_bias,
                              compute_dtype):
    if has_bias:
        (x_ref, y_ref, wqkv_ref, bqkv_ref, wproj_ref, bproj_ref,
         relb_ref, bias_ref, o_ref) = refs
    else:
        (x_ref, y_ref, wqkv_ref, bqkv_ref, wproj_ref, bproj_ref,
         relb_ref, o_ref) = refs
        bias_ref = None

    blk_b, n, c = x_ref.shape
    rows = blk_b * n
    H, D = num_heads, head_dim
    cdt = compute_dtype

    # ---- shared qkv projection: one MXU-shaped matmul per side --------------
    xw = x_ref[...].reshape(rows, c).astype(cdt)
    yw = y_ref[...].reshape(rows, c).astype(cdt)
    wqkv = wqkv_ref[...]                                   # (C, C) compute dtype
    bqkv = bqkv_ref[...]                                   # (1, C) f32

    q_full = jnp.dot(xw, wqkv, preferred_element_type=jnp.float32) + bqkv
    q_full = q_full * scale                                # (rows, C) f32
    kv_full = jnp.dot(yw, wqkv, preferred_element_type=jnp.float32) + bqkv
    # k == v (the same Linear applied to y), exactly as in the PyTorch module.

    q_cd = q_full.astype(cdt)
    kv_cd = kv_full.astype(cdt)

    # ---- head-major (Z = H * blk_b) batched layout ---------------------------
    # One stack of per-head lane slices (Mosaic lacks a cheap middle-dim
    # transpose); all downstream ops are single batched calls over Z.
    qh = jnp.stack([q_cd[:, h * D:(h + 1) * D] for h in range(H)], axis=0)
    kh = jnp.stack([kv_cd[:, h * D:(h + 1) * D] for h in range(H)], axis=0)
    z = H * blk_b
    qh = qh.reshape(z, n, D)                               # z = h * blk_b + b
    kh = kh.reshape(z, n, D)

    # ---- scores: ONE batched matmul, contraction on d (no K transpose) ------
    s = jnp.einsum('znd,zmd->znm', qh, kh,
                   preferred_element_type=jnp.float32)     # (Z, N, N) f32
    s = s.reshape(H, blk_b, n, n) + relb_ref[...][:, None]
    if has_bias:
        # Additive shifted-window mask (+ fused mask_in fill), kept in f32.
        s = s + bias_ref[...][None]
    s = s.reshape(z, n, n)

    # ---- ONE numerically-stable softmax over the whole (Z, N, N) slab -------
    m = jnp.max(s, axis=-1, keepdims=True)
    e = jnp.exp(s - m)
    p = e * pl.reciprocal(jnp.sum(e, axis=-1, keepdims=True), approx=True)

    # ---- attention output: ONE batched matmul (v == k) ----------------------
    o = jnp.einsum('znm,zmd->znd', p.astype(cdt), kh,
                   preferred_element_type=jnp.float32)     # (Z, N, D) f32
    o = o.reshape(H, rows, D).astype(cdt)

    # ---- output projection: lane-concat heads -> one MXU matmul -------------
    # (No VMEM scratch slab: the (rows, C) projection input stays in values.)
    proj_in = jnp.concatenate([o[h] for h in range(H)], axis=-1)   # (rows, C)
    out = jnp.dot(proj_in, wproj_ref[...],
                  preferred_element_type=jnp.float32) + bproj_ref[...]
    o_ref[...] = out.reshape(blk_b, n, c).astype(o_ref.dtype)


def _pick_block_b(b_total, n, *, must_divide=None, target_rows=256, min_grid=2):
    """Largest block_b dividing b_total (and `must_divide`) with ~target_rows
    rows per grid step, while keeping grid_b >= min_grid when possible (v7x has
    two TensorCores; a 1-step grid cannot be sharded across them)."""
    if must_divide is None:
        must_divide = b_total
    cap = b_total // min_grid if b_total >= min_grid else b_total
    cap = max(1, cap)
    want = max(1, min(cap, target_rows // max(1, n)))
    blk = 1
    for d in range(1, want + 1):
        if b_total % d == 0 and must_divide % d == 0:
            blk = d
    return blk


# ----------------------------------------------------------------------------
# Python wrapper: parameter plumbing + pallas_call.
# ----------------------------------------------------------------------------
def cross_window_attention(
    x, y, mask_in, mask,
    *,
    wqkv, bqkv, wproj, bproj,
    rel_pos_bias_table, rel_pos_index,
    num_heads, window_size, qk_scale=None,
    block_b=None, compute_dtype=jnp.bfloat16,
):
    B_, N, C = x.shape
    head_dim = C // num_heads
    assert head_dim * num_heads == C
    assert N == window_size[0] * window_size[1]
    scale = float(qk_scale if qk_scale is not None else head_dim ** (-0.5))

    has_bias = mask is not None
    # With no mask_in we can stream the raw (nW, N, N) mask (no (B_,N,N) tile).
    stream_raw_mask = has_bias and mask_in is None
    nW = int(mask.shape[0]) if has_bias else 0
    if has_bias:
        assert B_ % nW == 0, "num_windows must divide B_"

    if block_b is None:
        # ~256 rows per block is MXU-friendly on all generations.  On v6e
        # (128 MiB VMEM) target_rows can be raised to 384-512; keep it modest
        # on v7x (64 MiB VMEM / TC) or set vmem_limit_bytes explicitly.
        block_b = _pick_block_b(B_, N,
                                must_divide=nW if stream_raw_mask else B_)
    assert B_ % block_b == 0, "block_b must divide B_"
    grid_b = B_ // block_b

    # Gather relative position bias: (N*N,) -> (N, N, H) -> (H, N, N), f32.
    rel_bias = rel_pos_bias_table[rel_pos_index.reshape(-1)]
    rel_bias = rel_bias.reshape(N, N, num_heads).transpose(2, 0, 1)
    rel_bias = rel_bias.astype(jnp.float32)

    cdt = compute_dtype
    kernel = functools.partial(
        _cross_window_attn_kernel,
        num_heads=num_heads, head_dim=head_dim, scale=scale,
        has_bias=has_bias, compute_dtype=cdt)

    # Weights / biases / rel-bias use constant index_maps so they stay resident
    # across the grid.  (On v7x with large C, consider pipeline_mode=
    # pl.Buffered(1) on these specs and/or an explicit vmem_limit_bytes.)
    in_specs = [
        pl.BlockSpec((block_b, N, C), lambda b: (b, 0, 0)),        # x
        pl.BlockSpec((block_b, N, C), lambda b: (b, 0, 0)),        # y
        pl.BlockSpec((C, C), lambda b: (0, 0)),                    # wqkv (in,out)
        pl.BlockSpec((1, C), lambda b: (0, 0)),                    # bqkv
        pl.BlockSpec((C, C), lambda b: (0, 0)),                    # wproj (in,out)
        pl.BlockSpec((1, C), lambda b: (0, 0)),                    # bproj
        pl.BlockSpec((num_heads, N, N), lambda b: (0, 0, 0)),      # rel bias
    ]
    # x / y are passed in their original dtype; the bf16 cast happens inside
    # the kernel (halves their HBM traffic vs. a wrapper-side cast).
    args = [
        x, y,
        wqkv.T.astype(cdt), bqkv.reshape(1, C).astype(jnp.float32),
        wproj.T.astype(cdt), bproj.reshape(1, C).astype(jnp.float32),
        rel_bias,
    ]

    if has_bias:
        if stream_raw_mask:
            assert nW % block_b == 0, "block_b must divide num_windows"
            nwb = nW // block_b
            bias_arr = mask.astype(jnp.float32)                     # (nW, N, N)
            bias_spec = pl.BlockSpec((block_b, N, N),
                                     lambda b: (b % nwb, 0, 0))
        else:
            # Fuse the shifted-window mask and the mask_in fill into ONE f32
            # additive bias (kept in f32 so the finite -100 values add exactly).
            # NOTE: for fully-masked rows this differs negligibly from torch's
            # masked_fill semantics (-1e10 fill -> exp()==0 either way).
            bias_arr = jnp.tile(mask.astype(jnp.float32), (B_ // nW, 1, 1))
            bias_arr = bias_arr + jnp.where(mask_in == 0, -10000000000.0, 0.0
                                            ).astype(jnp.float32)
            bias_spec = pl.BlockSpec((block_b, N, N), lambda b: (b, 0, 0))
        in_specs.append(bias_spec)
        args.append(bias_arr)

    grid_spec = pltpu.PrefetchScalarGridSpec(
        num_scalar_prefetch=0,
        grid=(grid_b,),
        in_specs=in_specs,
        out_specs=pl.BlockSpec((block_b, N, C), lambda b: (b, 0, 0)),
    )

    return pl.pallas_call(
        kernel,
        out_shape=jax.ShapeDtypeStruct((B_, N, C), x.dtype),
        grid_spec=grid_spec,
        compiler_params=pltpu.CompilerParams(
            dimension_semantics=("parallel",)),
    )(*args)


# ----------------------------------------------------------------------------
# Pure-JAX reference (mirrors the PyTorch forward) for correctness checking.
# ----------------------------------------------------------------------------
def reference(x, y, mask_in, mask, *, wqkv, bqkv, wproj, bproj,
              rel_pos_bias_table, rel_pos_index, num_heads, qk_scale=None):
    B_, N, C = x.shape
    D = C // num_heads
    scale = qk_scale if qk_scale is not None else D ** (-0.5)
    q = (x @ wqkv.T + bqkv).reshape(B_, N, num_heads, D).transpose(0, 2, 1, 3)
    kv = (y @ wqkv.T + bqkv).reshape(B_, N, num_heads, D).transpose(0, 2, 1, 3)
    q = q * scale
    attn = q @ jnp.swapaxes(kv, -2, -1)
    rel_bias = rel_pos_bias_table[rel_pos_index.reshape(-1)]
    rel_bias = rel_bias.reshape(N, N, num_heads).transpose(2, 0, 1)
    attn = attn + rel_bias[None]
    if mask is not None:
        nW = mask.shape[0]
        attn = attn.reshape(B_ // nW, nW, num_heads, N, N) + mask[None, :, None]
        attn = attn.reshape(-1, num_heads, N, N)
        if mask_in is not None:
            attn = jnp.where(mask_in[:, None] == 0, -10000000000.0, attn)
    attn = jax.nn.softmax(attn, axis=-1)
    out = (attn @ kv).transpose(0, 2, 1, 3).reshape(B_, N, C)
    return out @ wproj.T + bproj


# ----------------------------------------------------------------------------
# Deterministic parameter / buffer construction (mirrors __init__).
# ----------------------------------------------------------------------------
def make_params(key, dim, window_size, num_heads):
    Wh, Ww = window_size
    k1, k2, k3, k4, k5 = jax.random.split(key, 5)
    table = 0.02 * jax.random.truncated_normal(
        k1, -2.0, 2.0, ((2 * Wh - 1) * (2 * Ww - 1), num_heads), jnp.float32)
    wqkv = 0.05 * jax.random.normal(k2, (dim, dim), jnp.float32)
    bqkv = 0.01 * jax.random.normal(k3, (dim,), jnp.float32)
    wproj = 0.05 * jax.random.normal(k4, (dim, dim), jnp.float32)
    bproj = 0.01 * jax.random.normal(k5, (dim,), jnp.float32)

    # relative_position_index buffer (same construction as the PyTorch module)
    coords_h = jnp.arange(Wh)
    coords_w = jnp.arange(Ww)
    coords = jnp.stack(jnp.meshgrid(coords_h, coords_w, indexing="ij"))
    coords_flat = coords.reshape(2, -1)                                  # (2, N)
    rel = coords_flat[:, :, None] - coords_flat[:, None, :]              # (2,N,N)
    rel = rel.transpose(1, 2, 0)                                         # (N,N,2)
    rel = rel.at[:, :, 0].add(Wh - 1)
    rel = rel.at[:, :, 1].add(Ww - 1)
    rel = rel.at[:, :, 0].multiply(2 * Ww - 1)
    rel_index = rel.sum(-1)                                              # (N, N)

    return dict(rel_pos_bias_table=table, rel_pos_index=rel_index,
                wqkv=wqkv, bqkv=bqkv, wproj=wproj, bproj=bproj)


if __name__ == "__main__":
    # Small shapes: dim=32, heads=4, window 4x4 (N=16), batch=2, 4 windows -> B_=8
    dim = 32
    num_heads = 4
    window_size = (4, 4)
    N = window_size[0] * window_size[1]
    batch = 2
    nW = 4
    B_ = batch * nW

    key = jax.random.PRNGKey(0)
    kp, kx, ky, km, kmi = jax.random.split(key, 5)
    params = make_params(kp, dim, window_size, num_heads)

    x = jax.random.normal(kx, (B_, N, dim), jnp.float32)
    y = jax.random.normal(ky, (B_, N, dim), jnp.float32)
    # shifted-window style additive mask: 0 / -100
    mask = jnp.where(jax.random.bernoulli(km, 0.8, (nW, N, N)), 0.0, -100.0)
    # mask_in: 1 = keep, 0 = fill with -1e10
    mask_in = jax.random.bernoulli(kmi, 0.9, (B_, N, N)).astype(jnp.float32)

    common = dict(num_heads=num_heads,
                  rel_pos_bias_table=params["rel_pos_bias_table"],
                  rel_pos_index=params["rel_pos_index"],
                  wqkv=params["wqkv"], bqkv=params["bqkv"],
                  wproj=params["wproj"], bproj=params["bproj"])

    ref_masked = reference(x, y, mask_in, mask, **common)
    ref_mask_only = reference(x, y, None, mask, **common)
    ref_plain = reference(x, y, None, None, **common)

    # 1) mask + mask_in, f32 MXU inputs -> tight tolerance
    out_f32 = jax.block_until_ready(cross_window_attention(
        x, y, mask_in, mask, window_size=window_size,
        compute_dtype=jnp.float32, **common))
    np.testing.assert_allclose(np.asarray(out_f32), np.asarray(ref_masked),
                               rtol=2e-2, atol=2e-2)

    # 2) mask + mask_in, default bf16 MXU inputs (f32 accumulation)
    out_bf = jax.block_until_ready(cross_window_attention(
        x, y, mask_in, mask, window_size=window_size, **common))
    np.testing.assert_allclose(np.asarray(out_bf), np.asarray(ref_masked),
                               rtol=1e-1, atol=1e-1)

    # 3) mask without mask_in: raw (nW,N,N) mask streamed via modulo index map
    out_m = jax.block_until_ready(cross_window_attention(
        x, y, None, mask, window_size=window_size,
        compute_dtype=jnp.float32, **common))
    np.testing.assert_allclose(np.asarray(out_m), np.asarray(ref_mask_only),
                               rtol=2e-2, atol=2e-2)

    # 4) no mask at all: specialized no-bias kernel (mask_in ignored, as in torch)
    out_p = jax.block_until_ready(cross_window_attention(
        x, y, mask_in, None, window_size=window_size,
        compute_dtype=jnp.float32, **common))
    np.testing.assert_allclose(np.asarray(out_p), np.asarray(ref_plain),
                               rtol=2e-2, atol=2e-2)

    # 5) explicit smaller block (grid of 4), masked path, f32
    out_b2 = jax.block_until_ready(cross_window_attention(
        x, y, mask_in, mask, window_size=window_size, block_b=2,
        compute_dtype=jnp.float32, **common))
    np.testing.assert_allclose(np.asarray(out_b2), np.asarray(ref_masked),
                               rtol=2e-2, atol=2e-2)

    # TODO(synk): attn_drop / proj_drop (Dropout) omitted — identity at p=0 / eval.
    print("KERNEL_OK")
</pallas_src>

<mosaic_0001>
module attributes {stable_mosaic.version = 11 : i64} {
  func.func @_cross_window_attn_kernel(%arg0: i32, %arg1: memref<4x16x32xf32, #tpu.memory_space<vmem>>, %arg2: memref<4x16x32xf32, #tpu.memory_space<vmem>>, %arg3: memref<32x32xf32, #tpu.memory_space<vmem>>, %arg4: memref<1x32xf32, #tpu.memory_space<vmem>>, %arg5: memref<32x32xf32, #tpu.memory_space<vmem>>, %arg6: memref<1x32xf32, #tpu.memory_space<vmem>>, %arg7: memref<4x16x16xf32, #tpu.memory_space<vmem>>, %arg8: memref<4x16x16xf32, #tpu.memory_space<vmem>>, %arg9: memref<4x16x32xf32, #tpu.memory_space<vmem>>) attributes {dimension_semantics = [#tpu.dimension_semantics<parallel>], iteration_bounds = array<i64: 2>, scalar_prefetch = 0 : i64, scratch_operands = 0 : i64, tpu.core_type = #tpu.core_type<tc>, window_params = [{transform_indices = @transform_0, window_bounds = array<i64: 4, 16, 32>}, {transform_indices = @transform_1, window_bounds = array<i64: 4, 16, 32>}, {pipeline_mode = #tpu.pipeline_mode<synchronous>, transform_indices = @transform_2, window_bounds = array<i64: 32, 32>}, {pipeline_mode = #tpu.pipeline_mode<synchronous>, transform_indices = @transform_3, window_bounds = array<i64: 1, 32>}, {pipeline_mode = #tpu.pipeline_mode<synchronous>, transform_indices = @transform_4, window_bounds = array<i64: 32, 32>}, {pipeline_mode = #tpu.pipeline_mode<synchronous>, transform_indices = @transform_5, window_bounds = array<i64: 1, 32>}, {pipeline_mode = #tpu.pipeline_mode<synchronous>, transform_indices = @transform_6, window_bounds = array<i64: 4, 16, 16>}, {transform_indices = @transform_7, window_bounds = array<i64: 4, 16, 16>}, {transform_indices = @transform_8, window_bounds = array<i64: 4, 16, 32>}]} {
    %c0 = arith.constant 0 : index
    %c0_0 = arith.constant 0 : index
    %c0_1 = arith.constant 0 : index
    %0 = vector.load %arg1[%c0, %c0_0, %c0_1] : memref<4x16x32xf32, #tpu.memory_space<vmem>>, vector<4x16x32xf32>
    %1 = vector.shape_cast %0 : vector<4x16x32xf32> to vector<64x32xf32>
    %c0_2 = arith.constant 0 : index
    %c0_3 = arith.constant 0 : index
    %c0_4 = arith.constant 0 : index
    %2 = vector.load %arg2[%c0_2, %c0_3, %c0_4] : memref<4x16x32xf32, #tpu.memory_space<vmem>>, vector<4x16x32xf32>
    %3 = vector.shape_cast %2 : vector<4x16x32xf32> to vector<64x32xf32>
    %c0_5 = arith.constant 0 : index
    %c0_6 = arith.constant 0 : index
    %4 = vector.load %arg3[%c0_5, %c0_6] : memref<32x32xf32, #tpu.memory_space<vmem>>, vector<32x32xf32>
    %c0_7 = arith.constant 0 : index
    %c0_8 = arith.constant 0 : index
    %5 = vector.load %arg4[%c0_7, %c0_8] : memref<1x32xf32, #tpu.memory_space<vmem>>, vector<1x32xf32>
    %cst = arith.constant dense<0.000000e+00> : vector<64x32xf32>
    %6 = tpu.matmul %1, %4, %cst {dimension_numbers = #tpu.dot_dimension_numbers<[1], [0], [0], [1], [0, 0, 1, 1], [], []>} : vector<64x32xf32>, vector<32x32xf32>, vector<64x32xf32> -> vector<64x32xf32>
    %7 = vector.broadcast %5 : vector<1x32xf32> to vector<64x32xf32>
    %8 = arith.addf %6, %7 : vector<64x32xf32>
    %cst_9 = arith.constant 0.353553385 : f32
    %9 = vector.broadcast %cst_9 : f32 to vector<64x32xf32>
    %10 = arith.mulf %8, %9 : vector<64x32xf32>
    %cst_10 = arith.constant dense<0.000000e+00> : vector<64x32xf32>
    %11 = tpu.matmul %3, %4, %cst_10 {dimension_numbers = #tpu.dot_dimension_numbers<[1], [0], [0], [1], [0, 0, 1, 1], [], []>} : vector<64x32xf32>, vector<32x32xf32>, vector<64x32xf32> -> vector<64x32xf32>
    %12 = vector.broadcast %5 : vector<1x32xf32> to vector<64x32xf32>
    %13 = arith.addf %11, %12 : vector<64x32xf32>
    %14 = vector.extract_strided_slice %10 {offsets = [0, 0], sizes = [64, 8], strides = [1, 1]} : vector<64x32xf32> to vector<64x8xf32>
    %15 = vector.extract_strided_slice %10 {offsets = [0, 8], sizes = [64, 8], strides = [1, 1]} : vector<64x32xf32> to vector<64x8xf32>
    %16 = vector.extract_strided_slice %10 {offsets = [0, 16], sizes = [64, 8], strides = [1, 1]} : vector<64x32xf32> to vector<64x8xf32>
    %17 = vector.extract_strided_slice %10 {offsets = [0, 24], sizes = [64, 8], strides = [1, 1]} : vector<64x32xf32> to vector<64x8xf32>
    %18 = vector.shape_cast %14 : vector<64x8xf32> to vector<1x64x8xf32>
    %19 = vector.shape_cast %15 : vector<64x8xf32> to vector<1x64x8xf32>
    %20 = vector.shape_cast %16 : vector<64x8xf32> to vector<1x64x8xf32>
    %21 = vector.shape_cast %17 : vector<64x8xf32> to vector<1x64x8xf32>
    %22 = tpu.concatenate %18, %19, %20, %21 in 0 : vector<1x64x8xf32>, vector<1x64x8xf32>, vector<1x64x8xf32>, vector<1x64x8xf32> -> vector<4x64x8xf32>
    %23 = vector.extract_strided_slice %13 {offsets = [0, 0], sizes = [64, 8], strides = [1, 1]} : vector<64x32xf32> to vector<64x8xf32>
    %24 = vector.extract_strided_slice %13 {offsets = [0, 8], sizes = [64, 8], strides = [1, 1]} : vector<64x32xf32> to vector<64x8xf32>
    %25 = vector.extract_strided_slice %13 {offsets = [0, 16], sizes = [64, 8], strides = [1, 1]} : vector<64x32xf32> to vector<64x8xf32>
    %26 = vector.extract_strided_slice %13 {offsets = [0, 24], sizes = [64, 8], strides = [1, 1]} : vector<64x32xf32> to vector<64x8xf32>
    %27 = vector.shape_cast %23 : vector<64x8xf32> to vector<1x64x8xf32>
    %28 = vector.shape_cast %24 : vector<64x8xf32> to vector<1x64x8xf32>
    %29 = vector.shape_cast %25 : vector<64x8xf32> to vector<1x64x8xf32>
    %30 = vector.shape_cast %26 : vector<64x8xf32> to vector<1x64x8xf32>
    %31 = tpu.concatenate %27, %28, %29, %30 in 0 : vector<1x64x8xf32>, vector<1x64x8xf32>, vector<1x64x8xf32>, vector<1x64x8xf32> -> vector<4x64x8xf32>
    %32 = vector.shape_cast %22 : vector<4x64x8xf32> to vector<16x16x8xf32>
    %33 = vector.shape_cast %31 : vector<4x64x8xf32> to vector<16x16x8xf32>
    "tpu.trace_start"() <{level = 10 : i32, message = "znd,zmd->znm"}> : () -> ()
    %cst_11 = arith.constant dense<0.000000e+00> : vector<16x16x16xf32>
    %34 = tpu.matmul %32, %33, %cst_11 {dimension_numbers = #tpu.dot_dimension_numbers<[2], [2], [1], [1], [0, 0, 0, 1, 1, 1], [0], [0]>} : vector<16x16x8xf32>, vector<16x16x8xf32>, vector<16x16x16xf32> -> vector<16x16x16xf32>
    "tpu.trace_stop"() : () -> ()
    %35 = vector.shape_cast %34 : vector<16x16x16xf32> to vector<4x4x16x16xf32>
    %c0_12 = arith.constant 0 : index
    %c0_13 = arith.constant 0 : index
    %c0_14 = arith.constant 0 : index
    %36 = vector.load %arg7[%c0_12, %c0_13, %c0_14] : memref<4x16x16xf32, #tpu.memory_space<vmem>>, vector<4x16x16xf32>
    %37 = vector.shape_cast %36 : vector<4x16x16xf32> to vector<4x1x16x16xf32>
    %38 = vector.broadcast %37 : vector<4x1x16x16xf32> to vector<4x4x16x16xf32>
    %39 = arith.addf %35, %38 : vector<4x4x16x16xf32>
    %c0_15 = arith.constant 0 : index
    %c0_16 = arith.constant 0 : index
    %c0_17 = arith.constant 0 : index
    %40 = vector.load %arg8[%c0_15, %c0_16, %c0_17] : memref<4x16x16xf32, #tpu.memory_space<vmem>>, vector<4x16x16xf32>
    %41 = vector.shape_cast %40 : vector<4x16x16xf32> to vector<1x4x16x16xf32>
    %42 = vector.broadcast %41 : vector<1x4x16x16xf32> to vector<4x4x16x16xf32>
    %43 = arith.addf %39, %42 : vector<4x4x16x16xf32>
    %44 = vector.shape_cast %43 : vector<4x4x16x16xf32> to vector<16x16x16xf32>
    %cst_18 = arith.constant dense<0xFF800000> : vector<16x16xf32>
    %45 = vector.multi_reduction <maximumf>, %44, %cst_18 [2] : vector<16x16x16xf32> to vector<16x16xf32>
    %46 = vector.shape_cast %45 : vector<16x16xf32> to vector<16x16x1xf32>
    %47 = vector.broadcast %46 : vector<16x16x1xf32> to vector<16x16x16xf32>
    %48 = arith.subf %44, %47 : vector<16x16x16xf32>
    %49 = math.exp %48 : vector<16x16x16xf32>
    %cst_19 = arith.constant dense<0.000000e+00> : vector<16x16xf32>
    %50 = vector.multi_reduction <add>, %49, %cst_19 [2] : vector<16x16x16xf32> to vector<16x16xf32>
    %51 = vector.shape_cast %50 : vector<16x16xf32> to vector<16x16x1xf32>
    %52 = tpu.reciprocal %51 {approx = true} : vector<16x16x1xf32> -> vector<16x16x1xf32>
    %53 = vector.broadcast %52 : vector<16x16x1xf32> to vector<16x16x16xf32>
    %54 = arith.mulf %49, %53 : vector<16x16x16xf32>
    "tpu.trace_start"() <{level = 10 : i32, message = "znm,zmd->znd"}> : () -> ()
    %cst_20 = arith.constant dense<0.000000e+00> : vector<16x16x8xf32>
    %55 = tpu.matmul %54, %33, %cst_20 {dimension_numbers = #tpu.dot_dimension_numbers<[2], [1], [1], [2], [0, 0, 0, 1, 1, 2], [0], [0]>} : vector<16x16x16xf32>, vector<16x16x8xf32>, vector<16x16x8xf32> -> vector<16x16x8xf32>
    "tpu.trace_stop"() : () -> ()
    %56 = vector.shape_cast %55 : vector<16x16x8xf32> to vector<4x64x8xf32>
    %57 = vector.extract_strided_slice %56 {offsets = [0, 0, 0], sizes = [1, 64, 8], strides = [1, 1, 1]} : vector<4x64x8xf32> to vector<1x64x8xf32>
    %58 = vector.shape_cast %57 : vector<1x64x8xf32> to vector<64x8xf32>
    %59 = vector.extract_strided_slice %56 {offsets = [1, 0, 0], sizes = [1, 64, 8], strides = [1, 1, 1]} : vector<4x64x8xf32> to vector<1x64x8xf32>
    %60 = vector.shape_cast %59 : vector<1x64x8xf32> to vector<64x8xf32>
    %61 = vector.extract_strided_slice %56 {offsets = [2, 0, 0], sizes = [1, 64, 8], strides = [1, 1, 1]} : vector<4x64x8xf32> to vector<1x64x8xf32>
    %62 = vector.shape_cast %61 : vector<1x64x8xf32> to vector<64x8xf32>
    %63 = vector.extract_strided_slice %56 {offsets = [3, 0, 0], sizes = [1, 64, 8], strides = [1, 1, 1]} : vector<4x64x8xf32> to vector<1x64x8xf32>
    %64 = vector.shape_cast %63 : vector<1x64x8xf32> to vector<64x8xf32>
    %65 = tpu.concatenate %58, %60, %62, %64 in 1 : vector<64x8xf32>, vector<64x8xf32>, vector<64x8xf32>, vector<64x8xf32> -> vector<64x32xf32>
    %c0_21 = arith.constant 0 : index
    %c0_22 = arith.constant 0 : index
    %66 = vector.load %arg5[%c0_21, %c0_22] : memref<32x32xf32, #tpu.memory_space<vmem>>, vector<32x32xf32>
    %cst_23 = arith.constant dense<0.000000e+00> : vector<64x32xf32>
    %67 = tpu.matmul %65, %66, %cst_23 {dimension_numbers = #tpu.dot_dimension_numbers<[1], [0], [0], [1], [0, 0, 1, 1], [], []>} : vector<64x32xf32>, vector<32x32xf32>, vector<64x32xf32> -> vector<64x32xf32>
    %c0_24 = arith.constant 0 : index
    %c0_25 = arith.constant 0 : index
    %68 = vector.load %arg6[%c0_24, %c0_25] : memref<1x32xf32, #tpu.memory_space<vmem>>, vector<1x32xf32>
    %69 = vector.broadcast %68 : vector<1x32xf32> to vector<64x32xf32>
    %70 = arith.addf %67, %69 : vector<64x32xf32>
    %71 = vector.shape_cast %70 : vector<64x32xf32> to vector<4x16x32xf32>
    %c0_26 = arith.constant 0 : index
    %c0_27 = arith.constant 0 : index
    %c0_28 = arith.constant 0 : index
    %72 = vector.load %arg9[%c0_26, %c0_27, %c0_28] : memref<4x16x32xf32, #tpu.memory_space<vmem>>, vector<4x16x32xf32>
    tpu.vector_store %arg9[%c0_26, %c0_27, %c0_28], %71 {strides = array<i32>} : memref<4x16x32xf32, #tpu.memory_space<vmem>>, vector<4x16x32xf32>,
    return
  }
  func.func @transform_0(%arg0: i32) -> (i32, i32, i32) {
    %c0_i32 = arith.constant 0 : i32
    %c0_i32_0 = arith.constant 0 : i32
    %c0_i32_1 = arith.constant 0 : i32
    return %arg0, %c0_i32, %c0_i32_0 : i32, i32, i32
  }
  func.func @transform_1(%arg0: i32) -> (i32, i32, i32) {
    %c0_i32 = arith.constant 0 : i32
    %c0_i32_0 = arith.constant 0 : i32
    %c0_i32_1 = arith.constant 0 : i32
    return %arg0, %c0_i32, %c0_i32_0 : i32, i32, i32
  }
  func.func @transform_2(%arg0: i32) -> (i32, i32) {
    %c0_i32 = arith.constant 0 : i32
    %c0_i32_0 = arith.constant 0 : i32
    %c0_i32_1 = arith.constant 0 : i32
    return %c0_i32, %c0_i32_0 : i32, i32
  }
  func.func @transform_3(%arg0: i32) -> (i32, i32) {
    %c0_i32 = arith.constant 0 : i32
    %c0_i32_0 = arith.constant 0 : i32
    %c0_i32_1 = arith.constant 0 : i32
    return %c0_i32, %c0_i32_0 : i32, i32
  }
  func.func @transform_4(%arg0: i32) -> (i32, i32) {
    %c0_i32 = arith.constant 0 : i32
    %c0_i32_0 = arith.constant 0 : i32
    %c0_i32_1 = arith.constant 0 : i32
    return %c0_i32, %c0_i32_0 : i32, i32
  }
  func.func @transform_5(%arg0: i32) -> (i32, i32) {
    %c0_i32 = arith.constant 0 : i32
    %c0_i32_0 = arith.constant 0 : i32
    %c0_i32_1 = arith.constant 0 : i32
    return %c0_i32, %c0_i32_0 : i32, i32
  }
  func.func @transform_6(%arg0: i32) -> (i32, i32, i32) {
    %c0_i32 = arith.constant 0 : i32
    %c0_i32_0 = arith.constant 0 : i32
    %c0_i32_1 = arith.constant 0 : i32
    %c0_i32_2 = arith.constant 0 : i32
    return %c0_i32, %c0_i32_0, %c0_i32_1 : i32, i32, i32
  }
  func.func @transform_7(%arg0: i32) -> (i32, i32, i32) {
    %c0_i32 = arith.constant 0 : i32
    %c0_i32_0 = arith.constant 0 : i32
    %c0_i32_1 = arith.constant 0 : i32
    return %arg0, %c0_i32, %c0_i32_0 : i32, i32, i32
  }
  func.func @transform_8(%arg0: i32) -> (i32, i32, i32) {
    %c0_i32 = arith.constant 0 : i32
    %c0_i32_0 = arith.constant 0 : i32
    %c0_i32_1 = arith.constant 0 : i32
    return %arg0, %c0_i32, %c0_i32_0 : i32, i32, i32
  }
}

</mosaic_0001>

<bundles_post_ra>
// kernel: tpu_custom_call.1
= control target key start
LH: loop header
LB: loop body
LE: loop exit
PB: predicated region body
PF: predicated region fallthrough
CT: control target
= control target key end

     0   :  { %s6924_s0 = inlined_call_operand.hbm [shape: f32[8,16,32], index: 0, kind: input, shape index: {}]   ;;  %s6925_s1 = inlined_call_operand.hbm [shape: f32[8,16,32], index: 1, kind: input, shape index: {}]   ;;  %s6926_s2 = inlined_call_operand.hbm [shape: f32[32,32], index: 2, kind: input, shape index: {}]   ;;  %s6927_s3 = inlined_call_operand.vmem [shape: f32[1,32], index: 3, kind: input, shape index: {}]   ;;  %s6928_s4 = inlined_call_operand.hbm [shape: f32[32,32], index: 4, kind: input, shape index: {}]   ;;  %s6929_s5 = inlined_call_operand.vmem [shape: f32[1,32], index: 5, kind: input, shape index: {}]   ;;  %s6930_s6 = inlined_call_operand.hbm [shape: f32[4,16,16], index: 6, kind: input, shape index: {}]   ;;  %s6931_s7 = inlined_call_operand.hbm [shape: f32[8,16,16], index: 7, kind: input, shape index: {}]   ;;  %s6932_s8 = inlined_call_operand.hbm [shape: f32[8,16,32], index: 8, kind: output, shape index: {}]  }
   0x1   :  { %6949 = sst [smem:[#allocation26_spill]] %s6924_s0 }
   0x2   :  { %6950 = sst [smem:[#allocation27_spill]] %s6926_s2 }
   0x3   :  { %6951 = sst [smem:[#allocation28_spill]] %s6928_s4 }
   0x4   :  { %6952 = sst [smem:[#allocation29_spill]] %s6930_s6 }
   0x5   :  { %13 = vsyncpa [#allocation3], 0 }
   0x6   :  { %15 = vsyncpa [#allocation3 + $0x1], 0 }
   0x7   :  { %16 = vsyncpa [#allocation6], 0 }
   0x8   :  { %18 = vsyncpa [#allocation6 + $0x1], 0 }
   0x9   :  { %19 = vsyncpa [#allocation9], 0 }
   0xa   :  { %20 = vsyncpa [#allocation12], 0 }
   0xb   :  { %22 = vsyncpa [#allocation12 + $0x1], 0 }
   0xc   :  { %23 = vsyncpa [#allocation4], 0 }
   0xd   :  { %25 = vsyncpa [#allocation4 + $0x1], 0  ;;  %s5774_s27 = smov 0   ;;  %s5776_s28 = smov 0  }
   0xe   :  { %s5778_s29 = smov 0   ;;  %s5780_s30 = smov 0  }
   0xf LB: > { %6953 = sst [smem:[#allocation20_spill]] %s5699_s27  ;;  %s5795_s9 = sadd.s32 4294967295, %s5711_s30   ;;  %s5711_s30 = sphi %s5780_s30, %s6995_s30   ;;  %s5707_s29 = sphi %s5778_s29, %s6994_s29   ;;  %s5703_s28 = sphi %s5776_s28, %s6993_s28   ;;  %s5699_s27 = sphi %s5774_s27, %s6992_s27  }
  0x10   : > { %s4373_s10 = sadd.s32 4294967294, %s5711_s30   ;;  %p51_p0 = scmp.ne.s32.totalorder %s5703_s28, %s5699_s27 }
  0x11   : > { %p6933_p1 = scmp.eq.s32.totalorder %s5795_s9, 0  ;;  %p238_p3 = scmp.eq.s32.totalorder %s4373_s10, 1 }
  0x12   : > { %p4374_p5 = scmp.ge.s32.totalorder %s5711_s30, 1  ;;  %p245_p7 = scmp.lt.s32.totalorder %s5711_s30, 3 }
  0x13   : > { %p5804_p4 = por %p6933_p1, %p51_p0  ;;  %p5809_p6 = por %p238_p3, %p51_p0 }
  0x14   : > { %p5814_p8 = pnand %p4374_p5, %p245_p7  ;;  %s5713_s14 = smov [#allocation7]  }
  0x15   : > { %s6954_s11 = scalar_select %p5804_p4, 1, 0 }
  0x16   : > { %s6955_s12 = scalar_select %p5809_p6, 1, 0 }
  0x17   : > { %s6957_s13 = scalar_select %p5814_p8, 1, 0 }
  0x18   : > { %6956 = sst [smem:[#allocation21_spill]] %s6955_s12  ;;  %s257_s15 = sshll.u32 %s5713_s14, 4  ;;  %s5818_s15 = int_to_ptr.vmem [resolvable:$true] %s257_s15 }
  0x19   : > { %p5191_p9 = pneg %p5814_p8  ;;  %s5714_s17 = smov [#allocation8]  }
  0x1a   : > { %s273_s18 = sshll.u32 %s5714_s17, 4  ;;  %s5715_s19 = smov [#allocation10]   ;;  %s5829_s18 = int_to_ptr.vmem [resolvable:$true] %s273_s18 }
  0x1b   : > { %p5825_p11 = pnand %p5191_p9, %p6933_p1  ;;  %s5831_s20 = sshll.u32 %s5715_s19, 4  ;;  %s290_s20 = int_to_ptr.vmem [resolvable:$true] %s5831_s20 }
  0x1c   : > { %s6959_s2 = sld [smem:[#allocation27_spill]] }
  0x1d   : > { %p5841_p13 = pneg %p5825_p11 }
  0x22   : > { %s5455_s23 = scalar_lea.hbm %s6959_s2, 512 }
  0x23   : > { %p5456_p12 = scmp.ne.s32.totalorder %s6959_s2, %s5455_s23  ;;  %p5462_p5 = scmp.lt.u32.totalorder %s5455_s23, %s6959_s2 }
  0x25   : > { %p5458_p0 = pnand %p5841_p13, %p5456_p12 }
  0x27   : > { %p5459_p3 = pneg %p5458_p0 }
  0x29   : > { %p5464_p7 = pnand %p5462_p5, %p5459_p3 }
  0x2b   : > { %5467 = shalt.err (!%p5464_p7)
}
  0x2c   : > { %s5468_s17 = scalar_lea.vmem %s5818_s15, 512  ;;  %p5476_p2 = scmp.lt.s32.totalorder %s5818_s15, %s5818_s15 }
  0x2d   : > { %p5469_p9 = scmp.ne.s32.totalorder %s5818_s15, %s5468_s17  ;;  %p5477_p6 = scmp.lt.s32.totalorder %s5468_s17, %s5468_s17 }
  0x2f   : > { %p5471_p10 = pnand %p5469_p9, %p5841_p13  ;;  %p5478_p12 = por %p5477_p6, %p5476_p2 }
  0x31   : > { %p5472_p1 = pneg %p5471_p10 }
  0x33   : > { %p5479_p0 = pnand %p5478_p12, %p5472_p1 }
  0x35   : > { %5482 = shalt.err (!%p5479_p0)
}
  0x36   : > { %s6938_s19 = smov 128   ;;  %s6940_s21 = smov 8  }
  0x37   : > { %5194 = dma.hbm_to_vmem [thread:$0]  (!%p5825_p11), %s6959_s2, 512, %s5818_s15, [#allocation6], %s6938_s19, %s6938_s19, %s6940_s21  }
  0x38   : > { %s6961_s4 = sld [smem:[#allocation28_spill]] }
  0x3e   : > { %s5483_s10 = scalar_lea.hbm %s6961_s4, 512 }
  0x3f   : > { %p5484_p1 = scmp.ne.s32.totalorder %s6961_s4, %s5483_s10  ;;  %p5490_p10 = scmp.lt.u32.totalorder %s5483_s10, %s6961_s4 }
  0x41   : > { %p5486_p2 = pnand %p5484_p1, %p5841_p13 }
  0x43   : > { %p5487_p6 = pneg %p5486_p2 }
  0x45   : > { %p5492_p3 = pnand %p5490_p10, %p5487_p6 }
  0x47   : > { %5495 = shalt.err (!%p5492_p3)
}
  0x48   : > { %s5496_s15 = scalar_lea.vmem %s5829_s18, 512  ;;  %p5504_p12 = scmp.lt.s32.totalorder %s5829_s18, %s5829_s18 }
  0x49   : > { %p5497_p5 = scmp.ne.s32.totalorder %s5829_s18, %s5496_s15  ;;  %p5505_p0 = scmp.lt.s32.totalorder %s5496_s15, %s5496_s15 }
  0x4b   : > { %p5499_p7 = pnand %p5497_p5, %p5841_p13  ;;  %p5506_p1 = por %p5505_p0, %p5504_p12 }
  0x4d   : > { %p5500_p9 = pneg %p5499_p7 }
  0x4f   : > { %p5507_p2 = pnand %p5506_p1, %p5500_p9 }
  0x51   : > { %5510 = shalt.err (!%p5507_p2)
}
  0x52   : > { %5197 = dma.hbm_to_vmem [thread:$0]  (!%p5825_p11), %s6961_s4, 512, %s5829_s18, [#allocation9], %s6938_s19, %s6938_s19, %s6940_s21  }
  0x53   : > { %s6962_s6 = sld [smem:[#allocation29_spill]] }
  0x59   : > { %s5511_s24 = scalar_lea.hbm %s6962_s6, 1024 }
  0x5a   : > { %p5512_p6 = scmp.ne.s32.totalorder %s6962_s6, %s5511_s24  ;;  %p5518_p5 = scmp.lt.u32.totalorder %s5511_s24, %s6962_s6 }
  0x5c   : > { %p5514_p10 = pnand %p5512_p6, %p5841_p13 }
  0x5e   : > { %p5515_p3 = pneg %p5514_p10 }
  0x60   : > { %p5520_p7 = pnand %p5518_p5, %p5515_p3 }
  0x62   : > { %5523 = shalt.err (!%p5520_p7)
}
  0x63   : > { %s5524_s15 = scalar_lea.vmem %s290_s20, 1024  ;;  %p5532_p1 = scmp.lt.s32.totalorder %s290_s20, %s290_s20 }
  0x64   : > { %p5525_p9 = scmp.ne.s32.totalorder %s290_s20, %s5524_s15  ;;  %p5533_p2 = scmp.lt.s32.totalorder %s5524_s15, %s5524_s15 }
  0x66   : > { %p5527_p12 = pnand %p5525_p9, %p5841_p13  ;;  %p5534_p4 = por %p5533_p2, %p5532_p1 }
  0x68   : > { %p5528_p0 = pneg %p5527_p12 }
  0x6a   : > { %p5535_p8 = pnand %p5534_p4, %p5528_p0 }
  0x6c   : > { %5538 = shalt.err (!%p5535_p8)
}
  0x6d   : > { %5200 = dma.hbm_to_vmem [thread:$0]  (!%p5825_p11), %s6962_s6, 1024, %s290_s20, [#allocation9], %s6938_s19, %s6938_s19, %s6940_s21  }
  0x6e   : > { %s5914_s26 = sadd.s32 1, %s5711_s30   ;;  %s38_s12 = sadd.s32 1, %s5707_s29 }
  0x6f   : > { %s35_s16 = ssub.s32 %s5711_s30, %s5914_s26  ;;  %p45_p8 = scmp.ne.s32.totalorder %s5707_s29, %s5703_s28 }
  0x70   : > { %p36_p4 = scmp.eq.s32.totalorder %s35_s16, 0  ;;  %p46_p13 = scmp.eq.s32.totalorder %s5711_s30, 0 }
  0x71   : > { %p5218_p6 = scmp.lt.s32.totalorder %s5711_s30, 2  ;;  %p6964_p3 = scmp.eq.s32.totalorder %s5795_s9, 1 }
  0x72   : > { %s5924_s22 = scalar_select %p36_p4, %s5707_s29, %s38_s12  }
  0x73   : > { %p47_p10 = por %p46_p13, %p45_p8  ;;  %p5928_p5 = por %p6964_p3, %p45_p8 }
  0x74   : > { %6963 = sst [smem:[#allocation22_spill]] %s5924_s22  ;;  %s5933_s24 = sand.u32 1, %s5707_s29  }
  0x75   : > { %s6965_s23 = scalar_select %p5928_p5, 1, 0 }
  0x76   : > { %s5936_s20 = sshll.u32 %s5711_s30, 10  ;;  %s5939_s25 = sshll.u32 %s5933_s24, 6 }
  0x77   : > { %s6966_s0 = sld [smem:[#allocation26_spill]]  ;;  %s307_s15 = scalar_lea.vmem [#allocation2], %s5939_s25 }
  0x78   : > { %s315_s18 = sshll.u32 %s307_s15, 4  ;;  %p5948_p11 = pnand %p5218_p6, %p47_p10  ;;  %s5952_s18 = int_to_ptr.vmem [resolvable:$true] %s315_s18 }
  0x79   : > { %s304_s12 = scalar_lea.sflag [#allocation3], %s5933_s24 }
  0x7a   : > { %p5960_p9 = pneg %p5948_p11 }
  0x7d   : > { %s5945_s17 = scalar_lea.hbm %s6966_s0, %s5936_s20  ;;  %s5544_s21 = scalar_lea.hbm %s6966_s0, 2048 }
  0x7e   : > { %s5539_s19 = scalar_lea.hbm %s5945_s17, 1024  ;;  %p5545_p1 = scmp.lt.u32.totalorder %s5945_s17, %s6966_s0 }
  0x7f   : > { %p5540_p7 = scmp.ne.s32.totalorder %s5945_s17, %s5539_s19  ;;  %p5546_p2 = scmp.lt.u32.totalorder %s5544_s21, %s5539_s19 }
  0x80   : > { %p5548_p8 = scmp.lt.u32.totalorder %s5539_s19, %s5945_s17 }
  0x81   : > { %p5542_p12 = pnand %p5960_p9, %p5540_p7  ;;  %p5547_p4 = por %p5546_p2, %p5545_p1 }
  0x83   : > { %p5543_p0 = pneg %p5542_p12  ;;  %p5549_p13 = por %p5548_p8, %p5547_p4 }
  0x85   : > { %p5550_p6 = pnand %p5549_p13, %p5543_p0 }
  0x87   : > { %5553 = shalt.err (!%p5550_p6)
}
  0x88   : > { %s5554_s16 = scalar_lea.vmem %s5952_s18, 1024  ;;  %s5718_s14 = smov [#allocation2]  }
  0x89   : > { %p5555_p10 = scmp.ne.s32.totalorder %s5952_s18, %s5554_s16  ;;  %s5559_s15 = sshll.u32 %s5718_s14, 4  ;;  %s5560_s15 = int_to_ptr.vmem [resolvable:$false] %s5559_s15 }
  0x8a   : > { %s5561_s2 = scalar_lea.vmem %s5560_s15, 2048  ;;  %p5562_p12 = scmp.lt.s32.totalorder %s5952_s18, %s5560_s15 }
  0x8b   : > { %p5557_p3 = pnand %p5555_p10, %p5960_p9  ;;  %p5563_p5 = scmp.lt.s32.totalorder %s5561_s2, %s5554_s16 }
  0x8d   : > { %p5558_p7 = pneg %p5557_p3  ;;  %p5564_p1 = por %p5563_p5, %p5562_p12 }
  0x8f   : > { %p5565_p2 = pnand %p5564_p1, %p5558_p7 }
  0x91   : > { %5568 = shalt.err (!%p5565_p2)
}
  0x92   : > { %s6969_s4 = smov 8   ;;  %s6970_s19 = smov 128  }
  0x93   : > { %5204 = dma.hbm_to_vmem [thread:$0]  (!%p5948_p11), %s5945_s17, 1024, %s5952_s18, %s304_s12, %s6970_s19, %s6970_s19, %s6969_s4  }
  0x94   : > { %s5992_s16 = scalar_lea.hbm %s6925_s1, %s5936_s20  ;;  %s329_s15 = scalar_lea.vmem [#allocation5], %s5939_s25 }
  0x95   : > { %s337_s2 = sshll.u32 %s329_s15, 4  ;;  %s6971_s0 = sand.u32 1, %s5711_s30   ;;  %s5995_s2 = int_to_ptr.vmem [resolvable:$true] %s337_s2 }
  0x96   : > { %s5999_s6 = scalar_lea.sflag [#allocation6], %s6971_s0  ;;  %s5569_s22 = scalar_lea.hbm %s5992_s16, 1024 }
  0x97   : > { %p5570_p5 = scmp.ne.s32.totalorder %s5992_s16, %s5569_s22  ;;  %s5574_s12 = scalar_lea.hbm %s6925_s1, 2048 }
  0x98   : > { %p5575_p8 = scmp.lt.u32.totalorder %s5992_s16, %s6925_s1  ;;  %p5576_p13 = scmp.lt.u32.totalorder %s5574_s12, %s5569_s22 }
  0x99   : > { %p5572_p0 = pnand %p5570_p5, %p5960_p9  ;;  %p5578_p10 = scmp.lt.u32.totalorder %s5569_s22, %s5992_s16 }
  0x9a   : > { %p5577_p6 = por %p5576_p13, %p5575_p8 }
  0x9b   : > { %p5573_p4 = pneg %p5572_p0 }
  0x9c   : > { %p5579_p3 = por %p5578_p10, %p5577_p6 }
  0x9e   : > { %p5580_p7 = pnand %p5579_p3, %p5573_p4 }
  0xa0   : > { %5583 = shalt.err (!%p5580_p7)
}
  0xa1   : > { %s5584_s0 = scalar_lea.vmem %s5995_s2, 1024  ;;  %s5719_s15 = smov [#allocation5]  }
  0xa2   : > { %p5585_p12 = scmp.ne.s32.totalorder %s5995_s2, %s5584_s0  ;;  %s5589_s17 = sshll.u32 %s5719_s15, 4  ;;  %s5590_s17 = int_to_ptr.vmem [resolvable:$false] %s5589_s17 }
  0xa3   : > { %s5591_s18 = scalar_lea.vmem %s5590_s17, 2048  ;;  %p5592_p5 = scmp.lt.s32.totalorder %s5995_s2, %s5590_s17 }
  0xa4   : > { %p5587_p1 = pnand %p5585_p12, %p5960_p9  ;;  %p5593_p0 = scmp.lt.s32.totalorder %s5591_s18, %s5584_s0 }
  0xa6   : > { %p5588_p2 = pneg %p5587_p1  ;;  %p5594_p8 = por %p5593_p0, %p5592_p5 }
  0xa8   : > { %p5595_p13 = pnand %p5594_p8, %p5588_p2 }
  0xaa   : > { %5598 = shalt.err (!%p5595_p13)
}
  0xab   : > { %5207 = dma.hbm_to_vmem [thread:$0]  (!%p5948_p11), %s5992_s16, 1024, %s5995_s2, %s5999_s6, %s6970_s19, %s6970_s19, %s6969_s4  }
  0xac   : > { %s6030_s21 = scalar_lea.hbm %s6931_s7, %s5936_s20  ;;  %s351_s14 = scalar_lea.vmem [#allocation11], %s5939_s25 }
  0xad   : > { %s359_s0 = sshll.u32 %s351_s14, 4  ;;  %s348_s15 = scalar_lea.sflag [#allocation12], %s5933_s24  ;;  %s6033_s0 = int_to_ptr.vmem [resolvable:$true] %s359_s0 }
  0xae   : > { %s5599_s17 = scalar_lea.hbm %s6030_s21, 1024  ;;  %s5604_s2 = scalar_lea.hbm %s6931_s7, 2048 }
  0xaf   : > { %p5600_p4 = scmp.ne.s32.totalorder %s6030_s21, %s5599_s17  ;;  %p5605_p3 = scmp.lt.u32.totalorder %s6030_s21, %s6931_s7 }
  0xb0   : > { %p5606_p7 = scmp.lt.u32.totalorder %s5604_s2, %s5599_s17  ;;  %p5608_p1 = scmp.lt.u32.totalorder %s5599_s17, %s6030_s21 }
  0xb1   : > { %p5602_p6 = pnand %p5600_p4, %p5960_p9 }
  0xb2   : > { %p5607_p12 = por %p5606_p7, %p5605_p3 }
  0xb3   : > { %p5603_p10 = pneg %p5602_p6 }
  0xb4   : > { %p5609_p2 = por %p5608_p1, %p5607_p12 }
  0xb6   : > { %p5610_p5 = pnand %p5609_p2, %p5603_p10 }
  0xb8   : > { %5613 = shalt.err (!%p5610_p5)
}
  0xb9   : > { %s5614_s25 = scalar_lea.vmem %s6033_s0, 1024  ;;  %s5720_s22 = smov [#allocation11]  }
  0xba   : > { %p5615_p0 = scmp.ne.s32.totalorder %s6033_s0, %s5614_s25  ;;  %s5619_s12 = sshll.u32 %s5720_s22, 4  ;;  %s5620_s12 = int_to_ptr.vmem [resolvable:$false] %s5619_s12 }
  0xbb   : > { %s5621_s14 = scalar_lea.vmem %s5620_s12, 2048  ;;  %p5622_p4 = scmp.lt.s32.totalorder %s6033_s0, %s5620_s12 }
  0xbc   : > { %p5617_p8 = pnand %p5615_p0, %p5960_p9  ;;  %p5623_p6 = scmp.lt.s32.totalorder %s5621_s14, %s5614_s25 }
  0xbe   : > { %p5618_p13 = pneg %p5617_p8  ;;  %p5624_p3 = por %p5623_p6, %p5622_p4 }
  0xc0   : > { %p5625_p7 = pnand %p5624_p3, %p5618_p13 }
  0xc2   : > { %5628 = shalt.err (!%p5625_p7)
}
  0xc3   : > { %5210 = dma.hbm_to_vmem [thread:$0]  (!%p5948_p11), %s6030_s21, 1024, %s6033_s0, %s348_s15, %s6970_s19, %s6970_s19, %s6969_s4  }
  0xc4   : > { %p6972_p9 = scmp.ne.s32.totalorder %s6957_s13, 0 }
  0xc6   : > { %371 = sbr.rel (%p6972_p9) target bundleno = 1732 (0x6c4), region = 52 }
  0xcd   : > { %s6065_s10 = sand.u32 1, %s5703_s28   ;;  %p6973_p10 = scmp.ne.s32.totalorder %s6954_s11, 0 }
  0xce   : > { %s6068_s17 = sshll.u32 %s6065_s10, 6  ;;  %s374_s27 = scalar_lea.sflag [#allocation3], %s6065_s10 }
  0xcf   : > { %s6072_s6 = scalar_lea.vmem [#allocation2], %s6068_s17 }
  0xd0   : > { %5674 = dma.done.wait (%p6973_p10), %s374_s27, 1024  }
  0xd1   : > { %5676 = vsyncadd (%p6973_p10), %s374_s27, 4294966272  ;;  %s382_s13 = sand.u32 1, %s5795_s9   ;;  %s6080_s4 = scalar_lea.vmem [#allocation5], %s6068_s17 }
  0xd2   : > { %s383_s24 = scalar_lea.sflag [#allocation6], %s382_s13 }
  0xd3   : > { %5678 = dma.done.wait (%p6973_p10), %s383_s24, 1024  }
  0xd4   : > { %5680 = vsyncadd (%p6973_p10), %s383_s24, 4294966272  ;;  %p6974_p11 = scmp.eq.s32.totalorder %s5795_s9, 0 }
  0xd6   : > { %5682 = dma.done.wait (%p6974_p11), [#allocation6], 512   ;;  %p6975_p12 = pmov %p6974_p11 }
  0xd7   : > { %p6976_p1 = pmov %p6974_p11 }
  0xd8   : > { %5684 = vsyncadd (%p6975_p12), [#allocation6], 4294966784 }
  0xd9   : > { %5686 = dma.done.wait (%p6976_p1), [#allocation9], 1536   ;;  %p6977_p2 = pmov %p6976_p1 }
  0xda   : > { %s404_s19 = scalar_lea.sflag [#allocation12], %s6065_s10  ;;  %s6096_s21 = scalar_lea.vmem [#allocation11], %s6068_s17 }
  0xdb   : > { %5688 = vsyncadd (%p6977_p2), [#allocation9], 4294965760 }
  0xdc   : > { %5690 = dma.done.wait (%p6973_p10), %s404_s19, 1024  }
  0xdd   : > { %5692 = vsyncadd (%p6973_p10), %s404_s19, 4294966272  ;;  %vm481_vm0 = vcmask 261120   ;;  %v470_v0 = vld [vmem:[#allocation7] sm:$0xff]  ;;  %v471_v1 = vld [vmem:[#allocation7 + $0x8] sm:$0xff]  ;;  %vm884_vm1 = vcmask 64512   ;;  %s5721_s15 = smov 120  }
  0xde   : > { %v472_v2 = vld [vmem:[#allocation7 + $0x10] sm:$0xff]  ;;  %v4983_v3 = vpack.c.bf16 %v471_v1, %v470_v0  ;;  %v473_v4 = vld [vmem:[#allocation7 + $0x18] sm:$0xff]  ;;  %v454_v5 = vld [vmem:[%s6072_s6] sm:$0xff]  ;;  %s5722_s16 = smov 112   ;;  %s5723_s2 = smov 104   ;;  %vm2293_vm3 = vcmask 130048  }
  0xdf   : > { %v458_v6 = vld [vmem:[%s6072_s6 + $0x20] sm:$0xff]  ;;  %v4987_v7 = vpack.c.bf16 %v473_v4, %v472_v2  ;;  %4707 = vmatprep.mubr.msk.f32.mxu0 %vm481_vm0, %v454_v5  ;;  %v455_v8 = vld [vmem:[%s6072_s6 + $0x8] sm:$0xff]  ;;  %v456_v10 = vld [vmem:[%s6072_s6 + $0x10] sm:$0xff]  ;;  %s5724_s20 = smov 8   ;;  %s5725_s18 = smov 16   ;;  %vm4054_vm4 = vcmask 195584  }
  0xe0   : > { %4713 = vmatprep.mubr.msk.f32.mxu1 %vm481_vm0, %v458_v6  ;;  %4984 = vmatprep.subr.bf16.mxu0 %v4983_v3  ;;  %v459_v9 = vld [vmem:[%s6072_s6 + $0x28] sm:$0xff]  ;;  %v460_v11 = vld [vmem:[%s6072_s6 + $0x30] sm:$0xff]  ;;  %v457_v12 = vld [vmem:[%s6072_s6 + $0x18] sm:$0xff]  ;;  %s5726_s25 = smov 24   ;;  %s449_s14 = scalar_lea.vmem [#allocation13], %s6068_s17 }
  0xe1   : > { %5167 = vmatprep.subr.bf16.mxu1 %v4983_v3  ;;  %4986 = vmatpush3.bf16.msra.mxu0 %v4983_v3  ;;  %v461_v13 = vld [vmem:[%s6072_s6 + $0x38] sm:$0xff]  ;;  %v462_v14 = vld [vmem:[%s6080_s4] sm:$0xff]  ;;  %v463_v15 = vld [vmem:[%s6080_s4 + $0x8] sm:$0xff]  ;;  %s4534_s27 = sshll.u32 %s5795_s9, 10  ;;  %s4226_s17 = sshll.u32 %s449_s14, 4  ;;  %s6877_s17 = int_to_ptr.vmem [resolvable:$true] %s4226_s17 }
  0xe2   : > { %5169 = vmatpush3.bf16.msra.mxu1 %v4983_v3  ;;  %4988 = vmatprep.subr.bf16.mxu0 %v4987_v7  ;;  %v464_v16 = vld [vmem:[%s6080_s4 + $0x10] sm:$0xff]  ;;  %v465_v17 = vld [vmem:[%s6080_s4 + $0x18] sm:$0xff]  ;;  %v466_v18 = vld [vmem:[%s6080_s4 + $0x20] sm:$0xff]  ;;  %s6875_s24 = scalar_lea.hbm %s6932_s8, %s4534_s27  ;;  %s4212_s9 = scalar_lea.sflag [#allocation4], %s6065_s10 }
  0xe3   : > { %5168 = vmatprep.subr.bf16.mxu1 %v4987_v7  ;;  %v467_v19 = vld [vmem:[%s6080_s4 + $0x28] sm:$0xff]  ;;  %v468_v20 = vld [vmem:[%s6080_s4 + $0x30] sm:$0xff]  ;;  %v469_v21 = vld [vmem:[%s6080_s4 + $0x38] sm:$0xff]  ;;  %s5629_s4 = scalar_lea.vmem %s6877_s17, 1024  ;;  %p6986_p0 = scmp.ne.s32.totalorder %s6965_s23, 0 }
  0xe4   : > { %v4399_v22 = vld [vmem:[%s6927_s3] ss:$0 sm:$0xff]  ;;  %vm6159_vm2 = vmpackc.low %vm884_vm1, %vm884_vm1  ;;  %v2214_v44 = vld [vmem:[#allocation10 + $0x8] sm:$0xff]  ;;  %p5630_p5 = scmp.ne.s32.totalorder %s6877_s17, %s5629_s4  ;;  %s5727_s19 = smov [#allocation13]  }
  0xe5   : > { %4990 = vmatpush3.bf16.msra.mxu0 %v4987_v7 }
  0xe6   : > { %5170 = vmatpush3.bf16.msra.mxu1 %v4987_v7  ;;  %p5631_p8 = pnand %p5630_p5, %p6986_p0 }
  0xe7   : > { %4992 = vmatprep.subr.bf16.mxu1 %v4983_v3 }
  0xe8   : > { %4708 = vmatmul.mubr.msk.f32.vlgmr.msra.gmra.mrb[0].mxu0 %vm481_vm0, %v455_v8  ;;  %p5632_p13 = pneg %p5631_p8 }
  0xe9   : > { %4714 = vmatmul.mubr.msk.f32.vlgmr.msra.gmra.mrb[0].mxu1 %vm481_vm0, %v459_v9  ;;  %4710 = vmatprep.mubr.msk.f32.mxu0 %vm481_vm0, %v456_v10 }
  0xea   : > { %4994 = vmatpush3.bf16.msra.mxu1 %v4983_v3  ;;  %4716 = vmatprep.mubr.msk.f32.mxu1 %vm481_vm0, %v460_v11 }
  0xeb   : > { %4996 = vmatprep.subr.bf16.mxu1 %v4987_v7 }
  0xec   : > { %4711 = vmatmul.mubr.msk.f32.gmra.mrb[2].mxu0 %vm481_vm0, %v457_v12 }
  0xed   : > { %4717 = vmatmul.mubr.msk.f32.gmra.mrb[2].mxu1 %vm481_vm0, %v461_v13 }
  0xee   : > { %4998 = vmatpush3.bf16.msra.mxu1 %v4987_v7  ;;  %4727 = vmatprep.mubr.msk.f32.mxu1 %vm481_vm0, %v462_v14 }
  0xf1   : > { %4728 = vmatmul.mubr.msk.f32.vlgmr.msra.gmra.mrb[4].mxu1 %vm481_vm0, %v463_v15 }
  0xf2   : > { %4730 = vmatprep.mubr.msk.f32.mxu1 %vm481_vm0, %v464_v16 }
  0xf5   : > { %4731 = vmatmul.mubr.msk.f32.gmra.mrb[6].mxu1 %vm481_vm0, %v465_v17 }
  0xf6   : > { %4733 = vmatprep.mubr.msk.f32.mxu1 %vm481_vm0, %v466_v18 }
  0xf9   : > { %4734 = vmatmul.mubr.msk.f32.gmra.mrb[8].mxu1 %vm481_vm0, %v467_v19 }
  0xfa   : > { %4736 = vmatprep.mubr.msk.f32.mxu1 %vm481_vm0, %v468_v20 }
  0xfd   : > { %4737 = vmatmul.mubr.msk.f32.gmra.mrb[10].mxu1 %vm481_vm0, %v469_v21 }
 0x1bb   : > { %v4709_v23 = vpop.f32.mrb[0].mxu0 }
 0x1bc   : > { %v4715_v24 = vpop.f32.mrb[0].mxu1  ;;  %v578_v25 = vadd.f32 %v4709_v23, %v4399_v22  ;;  %v572_v26 = vpop.f32.mrb[1].mxu0 }
 0x1bd   : > { %v592_v27 = vpop.f32.mrb[1].mxu1  ;;  %v573_v28 = vadd.f32 %v4399_v22, %v572_v26  ;;  %v598_v60 = vadd.f32 %v4715_v24, %v4399_v22 }
 0x1be   : > { %v6137_v29 = vmul.f32 0.35355338, %v578_v25  ;;  %v593_v33 = vadd.f32 %v4399_v22, %v592_v27 }
 0x1bf   : > { %v6139_v30 = vmul.f32 0.35355338, %v573_v28  ;;  %v4712_v31 = vpop.f32.mrb[2].mxu0  ;;  %v616_v4 = vmul.f32 0.35355338, %v598_v60 }
 0x1c0   : > { %v4718_v32 = vpop.f32.mrb[2].mxu1  ;;  %v582_v34 = vpop.f32.mrb[3].mxu0  ;;  %758 = vrot.lane.b32.xlu0 %v6137_v29, %s5721_s15  ;;  %v6149_v39 = vmul.f32 0.35355338, %v593_v33  ;;  %v588_v40 = vadd.f32 %v4712_v31, %v4399_v22 }
 0x1c1   : > { %v602_v35 = vpop.f32.mrb[3].mxu1  ;;  %v583_v36 = vadd.f32 %v4399_v22, %v582_v34  ;;  %756 = vrot.lane.b32.xlu1 %v6139_v30, %s5721_s15  ;;  %4743 = vmatprep.mubr.msk.f32.mxu0 %vm884_vm1, %v6139_v30  ;;  %v608_v49 = vadd.f32 %v4718_v32, %v4399_v22 }
 0x1c2   : > { %v6165_v48 = vmul.f32 0.35355338, %v588_v40  ;;  %v603_v2 = vadd.f32 %v4399_v22, %v602_v35 }
 0x1c3   : > { %v6147_v37 = vmul.f32 0.35355338, %v583_v36  ;;  %v618_v56 = vmul.f32 0.35355338, %v608_v49 }
 0x1c4   : > { %v4729_v38 = vpop.f32.mrb[4].mxu1  ;;  %v617_v7 = vmul.f32 0.35355338, %v603_v2 }
 0x1c5   : > { %v715_v41 = vadd.f32 %v4729_v38, %v4399_v22  ;;  %v709_v42 = vpop.f32.mrb[5].mxu1  ;;  %760 = vrot.lane.b32.xlu0 %v6147_v37, %s5721_s15  ;;  %4750 = vmatprep.mubr.msk.f32.mxu1 %vm884_vm1, %v6147_v37 }
 0x1c6   : > { %v710_v43 = vadd.f32 %v4399_v22, %v709_v42  ;;  %764 = vrot.lane.b32.xlu1 %v6149_v39, %s5721_s15 }
 0x1c8   : > { %v4732_v45 = vpop.f32.mrb[6].mxu1  ;;  %v6163_v46 = vpack.c.bf16 %v715_v41, %v710_v43  ;;  %v5267_v47 = vpack.i.bf16 %v715_v41, %v710_v43 }
 0x1c9   : > { %v725_v50 = vadd.f32 %v4732_v45, %v4399_v22  ;;  %v719_v51 = vpop.f32.mrb[7].mxu1 }
 0x1ca   : > { %v720_v52 = vadd.f32 %v4399_v22, %v719_v51  ;;  %5001 = vmatprep.subr.msk.bf16.mxu0 %vm6159_vm2, %v6163_v46  ;;  %5268 = vrot.lane.b32.xlu0 %v5267_v47, %s5721_s15 }
 0x1cb   : > { %762 = vrot.lane.b32.xlu1 %v6165_v48, %s5721_s15  ;;  %5004 = vmatpush3.bf16.xpose.msk.msra.mxu0 %vm6159_vm2, %v6163_v46 }
 0x1cc   : > { %v4735_v53 = vpop.f32.mrb[8].mxu1  ;;  %v6176_v54 = vpack.c.bf16 %v725_v50, %v720_v52  ;;  %v5277_v55 = vpack.i.bf16 %v725_v50, %v720_v52 }
 0x1cd   : > { %v735_v57 = vadd.f32 %v4735_v53, %v4399_v22  ;;  %v729_v58 = vpop.f32.mrb[9].mxu1 }
 0x1ce   : > { %v730_v59 = vadd.f32 %v4399_v22, %v729_v58  ;;  %5007 = vmatprep.subr.msk.bf16.mxu1 %vm6159_vm2, %v6176_v54  ;;  %5273 = vrot.lane.b32.xlu0 %v5267_v47, %s5722_s16 }
 0x1cf   : > { %770 = vrot.lane.b32.xlu1 %v618_v56, %s5721_s15  ;;  %5010 = vmatpush3.bf16.xpose.msk.msra.mxu1 %vm6159_vm2, %v6176_v54 }
 0x1d0   : > { %v4738_v61 = vpop.f32.mrb[10].mxu1  ;;  %v6186_v62 = vpack.c.bf16 %v735_v57, %v730_v59  ;;  %v5287_v63 = vpack.i.bf16 %v735_v57, %v730_v59 }
 0x1d1   : > { %v745_v0 = vadd.f32 %v4738_v61, %v4399_v22  ;;  %v739_v1 = vpop.f32.mrb[11].mxu1 }
 0x1d2   : > { %v740_v3 = vadd.f32 %v4399_v22, %v739_v1  ;;  %5013 = vmatprep.subr.msk.bf16.mxu0 %vm6159_vm2, %v6186_v62  ;;  %5278 = vrot.lane.b32.xlu0 %v5277_v55, %s5721_s15 }
 0x1d3   : > { %5283 = vrot.lane.b32.xlu1 %v5277_v55, %s5722_s16  ;;  %4744 = vmatmul.mubr.msk.f32.vlgmr.msra.gmra.mrb[4].mxu0 %vm884_vm1, %v6137_v29 }
 0x1d4   : > { %5016 = vmatpush3.bf16.xpose.msk.msra.mxu0 %vm6159_vm2, %v6186_v62  ;;  %4757 = vmatprep.mubr.msk.f32.mxu0 %vm884_vm1, %v6149_v39  ;;  %v6200_v5 = vpack.c.bf16 %v745_v0, %v740_v3  ;;  %v5297_v6 = vpack.i.bf16 %v745_v0, %v740_v3 }
 0x1d6   : > { %5019 = vmatprep.subr.msk.bf16.mxu1 %vm6159_vm2, %v6200_v5  ;;  %766 = vrot.lane.b32.xlu0 %v616_v4, %s5721_s15 }
 0x1d7   : > { %4751 = vmatmul.mubr.msk.f32.vlgmr.msra.gmra.mrb[12].mxu1 %vm884_vm1, %v6165_v48  ;;  %5288 = vrot.lane.b32.xlu1 %v5287_v63, %s5721_s15 }
 0x1d8   : > { %5022 = vmatpush3.bf16.xpose.msk.msra.mxu1 %vm6159_vm2, %v6200_v5  ;;  %4764 = vmatprep.mubr.msk.f32.mxu1 %vm884_vm1, %v617_v7 }
 0x1da   : > { %768 = vrot.lane.b32.xlu0 %v617_v7, %s5721_s15 }
 0x1db   : > { %5298 = vrot.lane.b32.xlu1 %v5297_v6, %s5721_s15  ;;  %4758 = vmatmul.mubr.msk.f32.vlgmr.msra.gmra.mrb[6].mxu0 %vm884_vm1, %v616_v4 }
 0x1de   : > { %5293 = vrot.lane.b32.xlu0 %v5287_v63, %s5722_s16 }
 0x1df   : > { %4765 = vmatmul.mubr.msk.f32.vlgmr.msra.gmra.mrb[14].mxu1 %vm884_vm1, %v618_v56  ;;  %772 = vrot.lane.b32.xlu1 %v6139_v30, %s5722_s16 }
 0x1e2   : > { %774 = vrot.lane.b32.xlu0 %v6137_v29, %s5722_s16 }
 0x1e3   : > { %778 = vrot.lane.b32.xlu1 %v6165_v48, %s5722_s16 }
 0x1e6   : > { %776 = vrot.lane.b32.xlu0 %v6147_v37, %s5722_s16 }
 0x1e7   : > { %780 = vrot.lane.b32.xlu1 %v6149_v39, %s5722_s16 }
 0x1ea   : > { %5303 = vrot.lane.b32.xlu0 %v5267_v47, %s5723_s2 }
 0x1eb   : > { %5308 = vrot.lane.b32.xlu1 %v5297_v6, %s5722_s16 }
 0x1ee   : > { %782 = vrot.lane.b32.xlu0 %v616_v4, %s5722_s16 }
 0x1ef   : > { %5313 = vrot.lane.b32.xlu1 %v5277_v55, %s5723_s2 }
 0x1f2   : > { %784 = vrot.lane.b32.xlu0 %v617_v7, %s5722_s16 }
 0x1f3   : > { %786 = vrot.lane.b32.xlu1 %v618_v56, %s5722_s16 }
 0x1f6   : > { %5318 = vrot.lane.b32.xlu0 %v5287_v63, %s5723_s2 }
 0x1f7   : > { %788 = vrot.lane.b32.xlu1 %v6139_v30, %s5723_s2 }
 0x1fa   : > { %790 = vrot.lane.b32.xlu0 %v6137_v29, %s5723_s2 }
 0x1fb   : > { %5323 = vrot.lane.b32.xlu1 %v5297_v6, %s5723_s2 }
 0x1fe   : > { %792 = vrot.lane.b32.xlu0 %v6147_v37, %s5723_s2 }
 0x1ff   : > { %794 = vrot.lane.b32.xlu1 %v6165_v48, %s5723_s2 }
 0x202   : > { %796 = vrot.lane.b32.xlu0 %v6149_v39, %s5723_s2 }
 0x203   : > { %798 = vrot.lane.b32.xlu1 %v616_v4, %s5723_s2 }
 0x206   : > { %800 = vrot.lane.b32.xlu0 %v617_v7, %s5723_s2 }
 0x207   : > { %802 = vrot.lane.b32.xlu1 %v618_v56, %s5723_s2 }
 0x232   : > { %v759_v8 = vpop.permute.xlu0 %758 }
 0x233   : > { %v757_v9 = vpop.permute.xlu1 %756 }
 0x234   : > { %4771 = vmatprep.mubr.msk.f32.mxu0 %vm884_vm1, %v757_v9 }
 0x237   : > { %v761_v10 = vpop.permute.xlu0 %760 }
 0x238   : > { %v765_v11 = vpop.permute.xlu1 %764  ;;  %4778 = vmatprep.mubr.msk.f32.mxu1 %vm884_vm1, %v761_v10 }
 0x23c   : > { %v5269_v12 = vpop.permute.xlu0 %5268 }
 0x23d   : > { %v5271_v13 = vunpack.i.h.bf16 %v5269_v12  ;;  %v5270_v14 = vunpack.i.l.bf16 %v5269_v12  ;;  %v763_v15 = vpop.permute.xlu1 %762 }
 0x23f   : > { %v6239_v16 = vpack.c.bf16 %v5271_v13, %v5270_v14 }
 0x240   : > { %v5274_v17 = vpop.permute.xlu0 %5273 }
 0x241   : > { %v771_v18 = vpop.permute.xlu1 %770  ;;  %5025 = vmatprep.subr.msk.bf16.mxu0 %vm6159_vm2, %v6239_v16  ;;  %v5276_v25 = vunpack.i.h.bf16 %v5274_v17  ;;  %v5275_v26 = vunpack.i.l.bf16 %v5274_v17 }
 0x242   : > { %5028 = vmatpush3.bf16.xpose.msk.msra.mxu0 %vm6159_vm2, %v6239_v16 }
 0x243   : > { %v6259_v32 = vpack.c.bf16 %v5276_v25, %v5275_v26  ;;  %v6364_v25 = vld [vmem:[%s6096_s21 + $0x8] sm:$0xff] }
 0x244   : > { %v5279_v19 = vpop.permute.xlu0 %5278 }
 0x245   : > { %v5281_v20 = vunpack.i.h.bf16 %v5279_v19  ;;  %v5280_v21 = vunpack.i.l.bf16 %v5279_v19  ;;  %v5284_v22 = vpop.permute.xlu1 %5283 }
 0x246   : > { %v5286_v34 = vunpack.i.h.bf16 %v5284_v22  ;;  %v5285_v35 = vunpack.i.l.bf16 %v5284_v22  ;;  %v2213_v22 = vld [vmem:[#allocation10] sm:$0xff] }
 0x247   : > { %v6247_v23 = vpack.c.bf16 %v5281_v20, %v5280_v21 }
 0x248   : > { %v767_v24 = vpop.permute.xlu0 %766  ;;  %v6273_v41 = vpack.c.bf16 %v5286_v34, %v5285_v35 }
 0x249   : > { %v5289_v27 = vpop.permute.xlu1 %5288  ;;  %4772 = vmatmul.mubr.msk.f32.vlgmr.msra.gmra.mrb[8].mxu0 %vm884_vm1, %v759_v8  ;;  %5031 = vmatprep.subr.msk.bf16.mxu1 %vm6159_vm2, %v6247_v23 }
 0x24a   : > { %v5291_v28 = vunpack.i.h.bf16 %v5289_v27  ;;  %v5290_v29 = vunpack.i.l.bf16 %v5289_v27  ;;  %5034 = vmatpush3.bf16.xpose.msk.msra.mxu1 %vm6159_vm2, %v6247_v23  ;;  %4785 = vmatprep.mubr.msk.f32.mxu0 %vm884_vm1, %v765_v11  ;;  %v6367_v27 = vld [vmem:[%s6096_s21] sm:$0xff] }
 0x24c   : > { %v6257_v30 = vpack.c.bf16 %v5291_v28, %v5290_v29  ;;  %v769_v31 = vpop.permute.xlu0 %768 }
 0x24d   : > { %v5299_v33 = vpop.permute.xlu1 %5298 }
 0x24e   : > { %v5301_v36 = vunpack.i.h.bf16 %v5299_v33  ;;  %v5300_v37 = vunpack.i.l.bf16 %v5299_v33  ;;  %5037 = vmatprep.subr.msk.bf16.mxu0 %vm6159_vm2, %v6257_v30  ;;  %v6376_v33 = vld [vmem:[%s6096_s21 + $0x18] sm:$0xff] }
 0x24f   : > { %5040 = vmatpush3.bf16.xpose.msk.msra.mxu0 %vm6159_vm2, %v6257_v30 }
 0x250   : > { %v6267_v38 = vpack.c.bf16 %v5301_v36, %v5300_v37  ;;  %5049 = vmatprep.subr.msk.bf16.mxu0 %vm6159_vm2, %v6259_v32  ;;  %v5294_v39 = vpop.permute.xlu0 %5293  ;;  %v6381_v37 = vld [vmem:[%s6096_s21 + $0x10] sm:$0xff] }
 0x251   : > { %v773_v40 = vpop.permute.xlu1 %772  ;;  %4779 = vmatmul.mubr.msk.f32.vlgmr.msra.gmra.mrb[16].mxu1 %vm884_vm1, %v763_v15  ;;  %v5296_v42 = vunpack.i.h.bf16 %v5294_v39  ;;  %v5295_v43 = vunpack.i.l.bf16 %v5294_v39 }
 0x252   : > { %5043 = vmatprep.subr.msk.bf16.mxu1 %vm6159_vm2, %v6267_v38  ;;  %4792 = vmatprep.mubr.msk.f32.mxu1 %vm884_vm1, %v769_v31 }
 0x253   : > { %5046 = vmatpush3.bf16.xpose.msk.msra.mxu1 %vm6159_vm2, %v6267_v38  ;;  %v6285_v48 = vpack.c.bf16 %v5296_v42, %v5295_v43 }
 0x254   : > { %5055 = vmatprep.subr.msk.bf16.mxu1 %vm6159_vm2, %v6273_v41  ;;  %v775_v45 = vpop.permute.xlu0 %774 }
 0x255   : > { %v779_v47 = vpop.permute.xlu1 %778 }
 0x256   : > { %4786 = vmatmul.mubr.msk.f32.vlgmr.msra.gmra.mrb[10].mxu0 %vm884_vm1, %v767_v24 }
 0x257   : > { %5052 = vmatpush3.bf16.xpose.msk.msra.mxu0 %vm6159_vm2, %v6259_v32  ;;  %4799 = vmatprep.mubr.msk.f32.mxu0 %vm884_vm1, %v773_v40 }
 0x258   : > { %5061 = vmatprep.subr.msk.bf16.mxu0 %vm6159_vm2, %v6285_v48  ;;  %v777_v49 = vpop.permute.xlu0 %776 }
 0x259   : > { %v781_v50 = vpop.permute.xlu1 %780 }
 0x25a   : > { %4793 = vmatmul.mubr.msk.f32.vlgmr.msra.gmra.mrb[18].mxu1 %vm884_vm1, %v771_v18 }
 0x25b   : > { %5058 = vmatpush3.bf16.xpose.msk.msra.mxu1 %vm6159_vm2, %v6273_v41  ;;  %4806 = vmatprep.mubr.msk.f32.mxu1 %vm884_vm1, %v777_v49 }
 0x25c   : > { %v5304_v51 = vpop.permute.xlu0 %5303 }
 0x25d   : > { %v5306_v52 = vunpack.i.h.bf16 %v5304_v51  ;;  %v5305_v53 = vunpack.i.l.bf16 %v5304_v51  ;;  %v5309_v55 = vpop.permute.xlu1 %5308 }
 0x25e   : > { %v5311_v56 = vunpack.i.h.bf16 %v5309_v55  ;;  %v5310_v57 = vunpack.i.l.bf16 %v5309_v55  ;;  %4800 = vmatmul.mubr.msk.f32.vlgmr.msra.gmra.mrb[12].mxu0 %vm884_vm1, %v775_v45 }
 0x25f   : > { %v6301_v58 = vpack.c.bf16 %v5306_v52, %v5305_v53  ;;  %5064 = vmatpush3.bf16.xpose.msk.msra.mxu0 %vm6159_vm2, %v6285_v48  ;;  %4813 = vmatprep.mubr.msk.f32.mxu0 %vm884_vm1, %v781_v50 }
 0x260   : > { %v6307_v59 = vpack.c.bf16 %v5311_v56, %v5310_v57  ;;  %v783_v60 = vpop.permute.xlu0 %782  ;;  %v6402_v56 = vld [vmem:[%s6096_s21 + $0x20] sm:$0xff] }
 0x261   : > { %v5314_v61 = vpop.permute.xlu1 %5313  ;;  %5073 = vmatprep.subr.msk.bf16.mxu0 %vm6159_vm2, %v6301_v58 }
 0x262   : > { %v5316_v63 = vunpack.i.h.bf16 %v5314_v61  ;;  %v5315_v0 = vunpack.i.l.bf16 %v5314_v61  ;;  %4807 = vmatmul.mubr.msk.f32.vlgmr.msra.gmra.mrb[20].mxu1 %vm884_vm1, %v779_v47  ;;  %5067 = vmatprep.subr.msk.bf16.mxu1 %vm6159_vm2, %v6307_v59  ;;  %v6392_v47 = vld [vmem:[%s6096_s21 + $0x28] sm:$0xff] }
 0x263   : > { %5070 = vmatpush3.bf16.xpose.msk.msra.mxu1 %vm6159_vm2, %v6307_v59 }
 0x264   : > { %v6319_v1 = vpack.c.bf16 %v5316_v63, %v5315_v0  ;;  %v785_v2 = vpop.permute.xlu0 %784 }
 0x265   : > { %v787_v3 = vpop.permute.xlu1 %786  ;;  %4820 = vmatprep.mubr.msk.f32.mxu1 %vm884_vm1, %v785_v2 }
 0x266   : > { %6980 = vst [vmem:[#allocation23_spill] sm:$0xff] %v6319_v1  ;;  %4814 = vmatmul.mubr.msk.f32.vlgmr.msra.gmra.mrb[14].mxu0 %vm884_vm1, %v783_v60  ;;  %5079 = vmatprep.subr.msk.bf16.mxu1 %vm6159_vm2, %v6319_v1  ;;  %v6405_v60 = vld [vmem:[%s6096_s21 + $0x38] sm:$0xff] }
 0x267   : > { %5076 = vmatpush3.bf16.xpose.msk.msra.mxu0 %vm6159_vm2, %v6301_v58 }
 0x268   : > { %v5319_v4 = vpop.permute.xlu0 %5318 }
 0x269   : > { %v5321_v6 = vunpack.i.h.bf16 %v5319_v4  ;;  %v5320_v7 = vunpack.i.l.bf16 %v5319_v4  ;;  %v789_v8 = vpop.permute.xlu1 %788  ;;  %v6413_v4 = vld [vmem:[%s6096_s21 + $0x30] sm:$0xff]  ;;  %s5633_s21 = sshll.u32 %s5727_s19, 4  ;;  %s5634_s21 = int_to_ptr.vmem [resolvable:$false] %s5633_s21 }
 0x26a   : > { %4821 = vmatmul.mubr.msk.f32.vlgmr.msra.gmra.mrb[22].mxu1 %vm884_vm1, %v787_v3  ;;  %4827 = vmatprep.mubr.msk.f32.mxu0 %vm884_vm1, %v789_v8  ;;  %s5635_s11 = scalar_lea.vmem %s5634_s21, 2048  ;;  %p5636_p4 = scmp.lt.s32.totalorder %s6877_s17, %s5634_s21 }
 0x26b   : > { %v6331_v9 = vpack.c.bf16 %v5321_v6, %v5320_v7  ;;  %5082 = vmatpush3.bf16.xpose.msk.msra.mxu1 %vm6159_vm2, %v6319_v1  ;;  %p5637_p6 = scmp.lt.s32.totalorder %s5635_s11, %s5629_s4 }
 0x26c   : > { %v791_v10 = vpop.permute.xlu0 %790 }
 0x26d   : > { %6981 = vst [vmem:[#allocation24_spill] sm:$0xff] %v6331_v9  ;;  %v5324_v11 = vpop.permute.xlu1 %5323  ;;  %5085 = vmatprep.subr.msk.bf16.mxu0 %vm6159_vm2, %v6331_v9  ;;  %p5638_p3 = por %p5637_p6, %p5636_p4 }
 0x26e   : > { %v5326_v12 = vunpack.i.h.bf16 %v5324_v11  ;;  %v5325_v13 = vunpack.i.l.bf16 %v5324_v11  ;;  %4828 = vmatmul.mubr.msk.f32.vlgmr.msra.gmra.mrb[16].mxu0 %vm884_vm1, %v791_v10 }
 0x26f   : > { %5088 = vmatpush3.bf16.xpose.msk.msra.mxu0 %vm6159_vm2, %v6331_v9  ;;  %p5639_p7 = pnand %p5638_p3, %p5632_p13 }
 0x270   : > { %v6343_v14 = vpack.c.bf16 %v5326_v12, %v5325_v13  ;;  %5096 = vmatprep.subr.bf16.mxu0 %v6163_v46  ;;  %v793_v15 = vpop.permute.xlu0 %792  ;;  %v2216_v12 = vld [vmem:[#allocation10 + $0x18] sm:$0xff]  ;;  %v2215_v13 = vld [vmem:[#allocation10 + $0x10] sm:$0xff] }
 0x271   : > { %v795_v17 = vpop.permute.xlu1 %794  ;;  %4834 = vmatprep.mubr.msk.f32.mxu1 %vm884_vm1, %v793_v15 }
 0x272   : > { %6982 = vst [vmem:[#allocation25_spill] sm:$0xff] %v6343_v14  ;;  %5091 = vmatprep.subr.msk.bf16.mxu1 %vm6159_vm2, %v6343_v14  ;;  %4835 = vmatmul.mubr.msk.f32.vlgmr.msra.gmra.mrb[24].mxu1 %vm884_vm1, %v795_v17 }
 0x273   : > { %5094 = vmatpush3.bf16.xpose.msk.msra.mxu1 %vm6159_vm2, %v6343_v14 }
 0x274   : > { %5100 = vmatprep.subr.bf16.mxu1 %v6176_v54  ;;  %v797_v18 = vpop.permute.xlu0 %796 }
 0x275   : > { %v799_v19 = vpop.permute.xlu1 %798  ;;  %4841 = vmatprep.mubr.msk.f32.mxu0 %vm884_vm1, %v797_v18 }
 0x276   : > { %4842 = vmatmul.mubr.msk.f32.vlgmr.msra.gmra.mrb[18].mxu0 %vm884_vm1, %v799_v19 }
 0x277   : > { %5098 = vmatpush3.bf16.msra.mxu0 %v6163_v46 }
 0x278   : > { %5104 = vmatprep.subr.bf16.mxu0 %v6186_v62  ;;  %v801_v20 = vpop.permute.xlu0 %800 }
 0x279   : > { %v803_v21 = vpop.permute.xlu1 %802  ;;  %4848 = vmatprep.mubr.msk.f32.mxu1 %vm884_vm1, %v801_v20 }
 0x27a   : > { %4849 = vmatmul.mubr.msk.f32.vlgmr.msra.gmra.mrb[26].mxu1 %vm884_vm1, %v803_v21 }
 0x27b   : > { %5102 = vmatpush3.bf16.msra.mxu1 %v6176_v54 }
 0x27c   : > { %5108 = vmatprep.subr.bf16.mxu1 %v6200_v5 }
 0x2a6   : > { %v4745_v24 = vpop.f32.mrb[4].mxu0 }
 0x2a7   : > { %v2222_v46 = vadd.f32 %v4745_v24, %v2214_v44  ;;  %v959_v26 = vpop.f32.mrb[5].mxu0 }
 0x2a8   : > { %v2221_v28 = vadd.f32 %v2213_v22, %v959_v26 }
 0x2a9   : > { %v6370_v29 = vadd.f32 %v6364_v25, %v2222_v46 }
 0x2aa   : > { %v4752_v31 = vpop.f32.mrb[12].mxu1  ;;  %v6373_v54 = vadd.f32 %v6367_v27, %v2221_v28 }
 0x2ab   : > { %v2224_v34 = vadd.f32 %v4752_v31, %v2214_v44  ;;  %v1042_v35 = vpop.f32.mrb[13].mxu1  ;;  %v2297_v36 = vsel %vm2293_vm3, %v6370_v29, -inf }
 0x2ac   : > { %v2223_v39 = vadd.f32 %v2213_v22, %v1042_v35  ;;  %2298 = vmax.xlane.f32.xlu1 %v2297_v36  ;;  %v2294_v40 = vsel %vm2293_vm3, %v6373_v54, -inf }
 0x2ad   : > { %2295 = vmax.xlane.f32.xlu0 %v2294_v40  ;;  %v6386_v42 = vadd.f32 %v6376_v33, %v2224_v34 }
 0x2ae   : > { %v4759_v43 = vpop.f32.mrb[6].mxu0  ;;  %v6389_v45 = vadd.f32 %v6381_v37, %v2223_v39 }
 0x2af   : > { %v2226_v49 = vadd.f32 %v4759_v43, %v2214_v44  ;;  %v1125_v50 = vpop.f32.mrb[7].mxu0  ;;  %v2303_v51 = vsel %vm2293_vm3, %v6386_v42, -inf }
 0x2b0   : > { %v2225_v52 = vadd.f32 %v2213_v22, %v1125_v50  ;;  %2304 = vmax.xlane.f32.xlu1 %v2303_v51  ;;  %v2300_v53 = vsel %vm2293_vm3, %v6389_v45, -inf }
 0x2b1   : > { %2301 = vmax.xlane.f32.xlu0 %v2300_v53  ;;  %v6399_v55 = vadd.f32 %v6392_v47, %v2226_v49 }
 0x2b2   : > { %v4766_v57 = vpop.f32.mrb[14].mxu1  ;;  %v6410_v3 = vadd.f32 %v6402_v56, %v2225_v52 }
 0x2b3   : > { %v2228_v61 = vadd.f32 %v4766_v57, %v2214_v44  ;;  %v1208_v63 = vpop.f32.mrb[15].mxu1  ;;  %v2309_v0 = vsel %vm2293_vm3, %v6399_v55, -inf }
 0x2b4   : > { %v2227_v2 = vadd.f32 %v2213_v22, %v1208_v63  ;;  %v2306_v10 = vsel %vm2293_vm3, %v6410_v3, -inf }
 0x2b5   : > { %2310 = vmax.xlane.f32.xlu0 %v2309_v0  ;;  %v6416_v6 = vadd.f32 %v6405_v60, %v2228_v61  ;;  %v2218_v0 = vld [vmem:[#allocation10 + $0x28] sm:$0xff] }
 0x2b6   : > { %v6421_v8 = vadd.f32 %v6413_v4, %v2227_v2  ;;  %v2217_v2 = vld [vmem:[#allocation10 + $0x20] sm:$0xff] }
 0x2b7   : > { %v2315_v7 = vsel %vm2293_vm3, %v6416_v6, -inf }
 0x2b8   : > { %2316 = vmax.xlane.f32.xlu1 %v2315_v7  ;;  %v2312_v11 = vsel %vm2293_vm3, %v6421_v8, -inf }
 0x2b9   : > { %2307 = vmax.xlane.f32.xlu0 %v2306_v10 }
 0x2bc   : > { %2313 = vmax.xlane.f32.xlu1 %v2312_v11 }
 0x31c   : > { %v4773_v15 = vpop.f32.mrb[8].mxu0 }
 0x31d   : > { %v2230_v17 = vadd.f32 %v4773_v15, %v2216_v12  ;;  %v1291_v18 = vpop.f32.mrb[9].mxu0 }
 0x31e   : > { %v2229_v19 = vadd.f32 %v2215_v13, %v1291_v18 }
 0x31f   : > { %v6428_v20 = vadd.f32 %v6364_v25, %v2230_v17 }
 0x320   : > { %v6433_v44 = vadd.f32 %v6367_v27, %v2229_v19 }
 0x321   : > { %v2321_v21 = vsel %vm2293_vm3, %v6428_v20, -inf }
 0x322   : > { %2322 = vmax.xlane.f32.xlu0 %v2321_v21  ;;  %v2318_v26 = vsel %vm2293_vm3, %v6433_v44, -inf }
 0x324   : > { %v4780_v22 = vpop.f32.mrb[16].mxu1 }
 0x325   : > { %v2232_v24 = vadd.f32 %v4780_v22, %v2216_v12  ;;  %v1374_v46 = vpop.f32.mrb[17].mxu1 }
 0x326   : > { %v2231_v28 = vadd.f32 %v2215_v13, %v1374_v46  ;;  %2319 = vmax.xlane.f32.xlu0 %v2318_v26 }
 0x327   : > { %v6438_v31 = vadd.f32 %v6376_v33, %v2232_v24 }
 0x328   : > { %v6443_v36 = vadd.f32 %v6381_v37, %v2231_v28 }
 0x329   : > { %v4787_v34 = vpop.f32.mrb[10].mxu0  ;;  %v2327_v35 = vsel %vm2293_vm3, %v6438_v31, -inf }
 0x32a   : > { %v2234_v39 = vadd.f32 %v4787_v34, %v2216_v12  ;;  %v1457_v40 = vpop.f32.mrb[11].mxu0  ;;  %2328 = vmax.xlane.f32.xlu1 %v2327_v35  ;;  %v2324_v51 = vsel %vm2293_vm3, %v6443_v36, -inf }
 0x32b   : > { %v2233_v43 = vadd.f32 %v2215_v13, %v1457_v40 }
 0x32c   : > { %v6446_v49 = vadd.f32 %v6392_v47, %v2234_v39 }
 0x32d   : > { %v4794_v50 = vpop.f32.mrb[18].mxu1  ;;  %v6453_v61 = vadd.f32 %v6402_v56, %v2233_v43 }
 0x32e   : > { %v2236_v52 = vadd.f32 %v4794_v50, %v2216_v12  ;;  %v1540_v53 = vpop.f32.mrb[19].mxu1  ;;  %2325 = vmax.xlane.f32.xlu1 %v2324_v51  ;;  %v2333_v57 = vsel %vm2293_vm3, %v6446_v49, -inf }
 0x32f   : > { %v2235_v63 = vadd.f32 %v2215_v13, %v1540_v53  ;;  %2334 = vmax.xlane.f32.xlu0 %v2333_v57  ;;  %v2330_v17 = vsel %vm2293_vm3, %v6453_v61, -inf }
 0x330   : > { %v6456_v7 = vadd.f32 %v6405_v60, %v2236_v52 }
 0x331   : > { %v4801_v10 = vpop.f32.mrb[12].mxu0  ;;  %v6463_v18 = vadd.f32 %v6413_v4, %v2235_v63 }
 0x332   : > { %v2238_v11 = vadd.f32 %v4801_v10, %v2218_v0  ;;  %v1623_v15 = vpop.f32.mrb[13].mxu0  ;;  %v2339_v12 = vsel %vm2293_vm3, %v6456_v7, -inf }
 0x333   : > { %v2237_v19 = vadd.f32 %v2217_v2, %v1623_v15  ;;  %2340 = vmax.xlane.f32.xlu1 %v2339_v12  ;;  %2331 = vmax.xlane.f32.xlu0 %v2330_v17  ;;  %v2336_v46 = vsel %vm2293_vm3, %v6463_v18, -inf }
 0x334   : > { %v6466_v13 = vadd.f32 %v6364_v25, %v2238_v11 }
 0x335   : > { %v4808_v21 = vpop.f32.mrb[20].mxu1  ;;  %v6473_v28 = vadd.f32 %v6367_v27, %v2237_v19 }
 0x336   : > { %v2240_v22 = vadd.f32 %v4808_v21, %v2218_v0  ;;  %v1706_v24 = vpop.f32.mrb[21].mxu1  ;;  %v2345_v26 = vsel %vm2293_vm3, %v6466_v13, -inf }
 0x337   : > { %v2239_v34 = vadd.f32 %v2217_v2, %v1706_v24  ;;  %2337 = vmax.xlane.f32.xlu1 %v2336_v46  ;;  %2346 = vmax.xlane.f32.xlu0 %v2345_v26  ;;  %v2342_v52 = vsel %vm2293_vm3, %v6473_v28, -inf  ;;  %v2220_v46 = vld [vmem:[#allocation10 + $0x38] sm:$0xff]  ;;  %v2219_v26 = vld [vmem:[#allocation10 + $0x30] sm:$0xff] }
 0x338   : > { %v6476_v35 = vadd.f32 %v6376_v33, %v2240_v22 }
 0x339   : > { %v4815_v39 = vpop.f32.mrb[14].mxu0  ;;  %v6483_v53 = vadd.f32 %v6381_v37, %v2239_v34  ;;  %v2299_v10 = vpop.xlane.xlu1 %2298 }
 0x33a   : > { %v2242_v40 = vadd.f32 %v4815_v39, %v2218_v0  ;;  %v2296_v43 = vpop.xlane.xlu0 %2295  ;;  %v1789_v50 = vpop.f32.mrb[15].mxu0  ;;  %v2351_v51 = vsel %vm2293_vm3, %v6476_v35, -inf }
 0x33b   : > { %v2241_v57 = vadd.f32 %v2217_v2, %v1789_v50  ;;  %2352 = vmax.xlane.f32.xlu1 %v2351_v51  ;;  %2343 = vmax.xlane.f32.xlu0 %v2342_v52  ;;  %v2348_v17 = vsel %vm2293_vm3, %v6483_v53, -inf  ;;  %v2390_v39 = vsub.f32 %v6373_v54, %v2296_v43 }
 0x33c   : > { %v6486_v63 = vadd.f32 %v6392_v47, %v2242_v40 }
 0x33d   : > { %v4822_v11 = vpop.f32.mrb[22].mxu1  ;;  %v6493_v21 = vadd.f32 %v6402_v56, %v2241_v57  ;;  %v2305_v52 = vpop.xlane.xlu1 %2304  ;;  %v2422_v43 = vmul.f32 1.442695, %v2390_v39 }
 0x33e   : > { %v2244_v15 = vadd.f32 %v4822_v11, %v2218_v0  ;;  %v1872_v12 = vpop.f32.mrb[23].mxu1  ;;  %v2357_v19 = vsel %vm2293_vm3, %v6486_v63, -inf  ;;  %v2302_v24 = vpop.xlane.xlu0 %2301 }
 0x33f   : > { %v2243_v22 = vadd.f32 %v2217_v2, %v1872_v12  ;;  %2349 = vmax.xlane.f32.xlu1 %v2348_v17  ;;  %2358 = vmax.xlane.f32.xlu0 %v2357_v19  ;;  %v2354_v51 = vsel %vm2293_vm3, %v6493_v21, -inf  ;;  %v2393_v19 = vsub.f32 %v6386_v42, %v2305_v52  ;;  %5327 = vpow2.f32 %v2422_v43 }
 0x340   : > { %v6496_v34 = vadd.f32 %v6405_v60, %v2244_v15  ;;  %v2391_v15 = vsub.f32 %v6370_v29, %v2299_v10 }
 0x341   : > { %v4829_v0 = vpop.f32.mrb[16].mxu0  ;;  %v6504_v2 = vadd.f32 %v6413_v4, %v2243_v22 }
 0x342   : > { %v1955_v40 = vpop.f32.mrb[17].mxu0  ;;  %v2363_v50 = vsel %vm2293_vm3, %v6496_v34, -inf  ;;  %v2246_v57 = vadd.f32 %v4829_v0, %v2220_v46  ;;  %v2311_v12 = vpop.xlane.xlu0 %2310  ;;  %v2424_v10 = vmul.f32 1.442695, %v2391_v15 }
 0x343   : > { %v2245_v11 = vadd.f32 %v2219_v26, %v1955_v40  ;;  %2364 = vmax.xlane.f32.xlu1 %v2363_v50  ;;  %2355 = vmax.xlane.f32.xlu0 %v2354_v51  ;;  %v2360_v22 = vsel %vm2293_vm3, %v6504_v2, -inf  ;;  %v2428_v50 = vmul.f32 1.442695, %v2393_v19 }
 0x344   : > { %v6516_v29 = vadd.f32 %v6364_v25, %v2246_v57  ;;  %5329 = vpow2.f32 %v2424_v10 }
 0x345   : > { %v4836_v17 = vpop.f32.mrb[24].mxu1  ;;  %v6508_v54 = vadd.f32 %v6367_v27, %v2245_v11  ;;  %v2392_v27 = vsub.f32 %v6389_v45, %v2302_v24  ;;  %v2317_v39 = vpop.xlane.xlu1 %2316  ;;  %5331 = vpow2.f32 %v2428_v50 }
 0x346   : > { %v2248_v14 = vadd.f32 %v4836_v17, %v2220_v46  ;;  %v2038_v9 = vpop.f32.mrb[25].mxu1  ;;  %v2308_v11 = vpop.xlane.xlu0 %2307  ;;  %v2369_v15 = vsel %vm2293_vm3, %v6516_v29, -inf }
 0x347   : > { %v2247_v1 = vadd.f32 %v2219_v26, %v2038_v9  ;;  %2361 = vmax.xlane.f32.xlu1 %v2360_v22  ;;  %v2366_v0 = vsel %vm2293_vm3, %v6508_v54, -inf  ;;  %v2395_v9 = vsub.f32 %v6399_v55, %v2311_v12 }
 0x348   : > { %2367 = vmax.xlane.f32.xlu0 %v2366_v0  ;;  %v6524_v52 = vadd.f32 %v6376_v33, %v2248_v14  ;;  %v2394_v33 = vsub.f32 %v6410_v3, %v2308_v11 }
 0x349   : > { %v4843_v40 = vpop.f32.mrb[18].mxu0  ;;  %v6520_v42 = vadd.f32 %v6381_v37, %v2247_v1  ;;  %v2426_v1 = vmul.f32 1.442695, %v2392_v27  ;;  %v2397_v37 = vsub.f32 %v6416_v6, %v2317_v39  ;;  %v2432_v14 = vmul.f32 1.442695, %v2395_v9  ;;  %v2314_v43 = vpop.xlane.xlu1 %2313 }
 0x34a   : > { %v2121_v51 = vpop.f32.mrb[19].mxu0  ;;  %v2250_v25 = vadd.f32 %v4843_v40, %v2220_v46  ;;  %v2375_v17 = vsel %vm2293_vm3, %v6524_v52, -inf  ;;  %v2430_v3 = vmul.f32 1.442695, %v2394_v33  ;;  %v2396_v27 = vsub.f32 %v6421_v8, %v2314_v43  ;;  %v6553_v39 = vpop.eup %5327 }
 0x34b   : > { %v2249_v57 = vadd.f32 %v2219_v26, %v2121_v51  ;;  %v2372_v45 = vsel %vm2293_vm3, %v6520_v42, -inf  ;;  %5333 = vpow2.f32 %v2426_v1  ;;  %v2486_v50 = vsel %vm2293_vm3, %v6553_v39, 0.0 }
 0x34c   : > { %2370 = vmax.xlane.f32.xlu0 %v2369_v15  ;;  %2373 = vmax.xlane.f32.xlu1 %v2372_v45  ;;  %v6540_v6 = vadd.f32 %v6392_v47, %v2250_v25  ;;  %5335 = vpow2.f32 %v2432_v14 }
 0x34d   : > { %v4850_v55 = vpop.f32.mrb[26].mxu1  ;;  %v6532_v24 = vadd.f32 %v6402_v56, %v2249_v57  ;;  %v2436_v56 = vmul.f32 1.442695, %v2397_v37 }
 0x34e   : > { %v2204_v12 = vpop.f32.mrb[27].mxu1  ;;  %v2252_v19 = vadd.f32 %v4850_v55, %v2220_v46  ;;  %v2381_v46 = vsel %vm2293_vm3, %v6540_v6, -inf  ;;  %v6555_v40 = vpop.eup %5329 }
 0x34f   : > { %v2251_v22 = vadd.f32 %v2219_v26, %v2204_v12  ;;  %v2378_v0 = vsel %vm2293_vm3, %v6532_v24, -inf  ;;  %5337 = vpow2.f32 %v2436_v56  ;;  %v6561_v9 = vpop.eup %5331  ;;  %v2489_v51 = vsel %vm2293_vm3, %v6555_v40, 0.0 }
 0x350   : > { %2376 = vmax.xlane.f32.xlu0 %v2375_v17  ;;  %2379 = vmax.xlane.f32.xlu1 %v2378_v0  ;;  %v6551_v47 = vadd.f32 %v6405_v60, %v2252_v19  ;;  %5339 = vpow2.f32 %v2430_v3  ;;  %v2495_v11 = vsel %vm2293_vm3, %v6561_v9, 0.0 }
 0x351   : > { %v6543_v10 = vadd.f32 %v6413_v4, %v2251_v22  ;;  %v2434_v4 = vmul.f32 1.442695, %v2396_v27 }
 0x352   : > { %v2387_v8 = vsel %vm2293_vm3, %v6551_v47, -inf }
 0x353   : > { %v2384_v26 = vsel %vm2293_vm3, %v6543_v10, -inf  ;;  %5341 = vpow2.f32 %v2434_v4 }
 0x354   : > { %2382 = vmax.xlane.f32.xlu0 %v2381_v46  ;;  %2385 = vmax.xlane.f32.xlu1 %v2384_v26 }
 0x355   : > { %v6563_v60 = vpop.eup %5333 }
 0x356   : > { %v6569_v25 = vpop.eup %5335  ;;  %v2492_v45 = vsel %vm2293_vm3, %v6563_v60, 0.0 }
 0x357   : > { %v2501_v15 = vsel %vm2293_vm3, %v6569_v25, 0.0 }
 0x358   : > { %2388 = vmax.xlane.f32.xlu0 %v2387_v8  ;;  %2487 = vadd.xlane.f32.xlu1 %v2486_v50 }
 0x359   : > { %v6571_v57 = vpop.eup %5337 }
 0x35a   : > { %v6577_v1 = vpop.eup %5339  ;;  %v2507_v55 = vsel %vm2293_vm3, %v6571_v57, 0.0 }
 0x35b   : > { %v2498_v37 = vsel %vm2293_vm3, %v6577_v1, 0.0 }
 0x35c   : > { %2490 = vadd.xlane.f32.xlu0 %v2489_v51  ;;  %2496 = vadd.xlane.f32.xlu1 %v2495_v11 }
 0x35d   : > { %v6583_v14 = vpop.eup %5341 }
 0x35e   : > { %v2504_v33 = vsel %vm2293_vm3, %v6583_v14, 0.0 }
 0x360   : > { %2502 = vadd.xlane.f32.xlu0 %v2501_v15  ;;  %2493 = vadd.xlane.f32.xlu1 %v2492_v45 }
 0x364   : > { %2499 = vadd.xlane.f32.xlu0 %v2498_v37  ;;  %2508 = vadd.xlane.f32.xlu1 %v2507_v55 }
 0x368   : > { %2505 = vadd.xlane.f32.xlu1 %v2504_v33 }
 0x3af   : > { %v2323_v12 = vpop.xlane.xlu0 %2322 }
 0x3b0   : > { %v2399_v17 = vsub.f32 %v6428_v20, %v2323_v12 }
 0x3b2   : > { %v2440_v43 = vmul.f32 1.442695, %v2399_v17 }
 0x3b3   : > { %v2320_v19 = vpop.xlane.xlu0 %2319 }
 0x3b4   : > { %5343 = vpow2.f32 %v2440_v43  ;;  %v2398_v22 = vsub.f32 %v6433_v44, %v2320_v19 }
 0x3b6   : > { %v2438_v0 = vmul.f32 1.442695, %v2398_v22 }
 0x3b7   : > { %v2329_v56 = vpop.xlane.xlu1 %2328 }
 0x3b8   : > { %5345 = vpow2.f32 %v2438_v0  ;;  %v2401_v3 = vsub.f32 %v6438_v31, %v2329_v56 }
 0x3ba   : > { %v2444_v27 = vmul.f32 1.442695, %v2401_v3 }
 0x3bb   : > { %v2326_v46 = vpop.xlane.xlu1 %2325 }
 0x3bc   : > { %5347 = vpow2.f32 %v2444_v27  ;;  %v2400_v26 = vsub.f32 %v6443_v36, %v2326_v46  ;;  %v2335_v4 = vpop.xlane.xlu0 %2334 }
 0x3bd   : > { %v2403_v8 = vsub.f32 %v6446_v49, %v2335_v4 }
 0x3be   : > { %v6592_v50 = vpop.eup %5343  ;;  %v2442_v20 = vmul.f32 1.442695, %v2400_v26 }
 0x3bf   : > { %v2448_v51 = vmul.f32 1.442695, %v2403_v8  ;;  %v2513_v44 = vsel %vm2293_vm3, %v6592_v50, 0.0 }
 0x3c0   : > { %5349 = vpow2.f32 %v2442_v20  ;;  %v2341_v11 = vpop.xlane.xlu1 %2340  ;;  %v2332_v15 = vpop.xlane.xlu0 %2331  ;;  %2514 = vadd.xlane.f32.xlu0 %v2513_v44 }
 0x3c1   : > { %5351 = vpow2.f32 %v2448_v51  ;;  %v2405_v31 = vsub.f32 %v6456_v7, %v2341_v11  ;;  %v2402_v45 = vsub.f32 %v6453_v61, %v2332_v15 }
 0x3c2   : > { %v6598_v36 = vpop.eup %5345 }
 0x3c3   : > { %v2452_v37 = vmul.f32 1.442695, %v2405_v31  ;;  %v2446_v49 = vmul.f32 1.442695, %v2402_v45  ;;  %v2510_v55 = vsel %vm2293_vm3, %v6598_v36, 0.0 }
 0x3c4   : > { %v2338_v33 = vpop.xlane.xlu1 %2337  ;;  %v2347_v12 = vpop.xlane.xlu0 %2346  ;;  %2511 = vadd.xlane.f32.xlu0 %v2510_v55 }
 0x3c5   : > { %5353 = vpow2.f32 %v2452_v37  ;;  %v2404_v17 = vsub.f32 %v6463_v18, %v2338_v33  ;;  %v2407_v43 = vsub.f32 %v6466_v13, %v2347_v12 }
 0x3c6   : > { %v6604_v19 = vpop.eup %5347  ;;  %5355 = vpow2.f32 %v2446_v49 }
 0x3c7   : > { %v2450_v7 = vmul.f32 1.442695, %v2404_v17  ;;  %v2456_v61 = vmul.f32 1.442695, %v2407_v43  ;;  %v2519_v22 = vsel %vm2293_vm3, %v6604_v19, 0.0 }
 0x3c8   : > { %v2353_v0 = vpop.xlane.xlu1 %2352  ;;  %v2344_v56 = vpop.xlane.xlu0 %2343  ;;  %2520 = vadd.xlane.f32.xlu1 %v2519_v22 }
 0x3c9   : > { %5357 = vpow2.f32 %v2450_v7  ;;  %v2409_v3 = vsub.f32 %v6476_v35, %v2353_v0  ;;  %v2406_v27 = vsub.f32 %v6473_v28, %v2344_v56 }
 0x3ca   : > { %v6610_v46 = vpop.eup %5349  ;;  %5359 = vpow2.f32 %v2456_v61 }
 0x3cb   : > { %v6612_v18 = vpop.eup %5351  ;;  %v2460_v13 = vmul.f32 1.442695, %v2409_v3  ;;  %v2454_v26 = vmul.f32 1.442695, %v2406_v27  ;;  %v2516_v4 = vsel %vm2293_vm3, %v6610_v46, 0.0 }
 0x3cc   : > { %v2350_v8 = vpop.xlane.xlu1 %2349  ;;  %v2359_v20 = vpop.xlane.xlu0 %2358  ;;  %v2525_v51 = vsel %vm2293_vm3, %v6612_v18, 0.0  ;;  %2517 = vadd.xlane.f32.xlu1 %v2516_v4 }
 0x3cd   : > { %5361 = vpow2.f32 %v2460_v13  ;;  %v2408_v35 = vsub.f32 %v6483_v53, %v2350_v8  ;;  %v2411_v28 = vsub.f32 %v6486_v63, %v2359_v20  ;;  %2526 = vadd.xlane.f32.xlu0 %v2525_v51 }
 0x3ce   : > { %5363 = vpow2.f32 %v2454_v26 }
 0x3cf   : > { %v6620_v44 = vpop.eup %5353  ;;  %v2458_v11 = vmul.f32 1.442695, %v2408_v35  ;;  %v2464_v15 = vmul.f32 1.442695, %v2411_v28 }
 0x3d0   : > { %v6622_v31 = vpop.eup %5355  ;;  %v2365_v45 = vpop.xlane.xlu1 %2364  ;;  %v2531_v49 = vsel %vm2293_vm3, %v6620_v44, 0.0 }
 0x3d1   : > { %v2356_v37 = vpop.xlane.xlu0 %2355  ;;  %5365 = vpow2.f32 %v2458_v11  ;;  %v2413_v55 = vsub.f32 %v6496_v34, %v2365_v45  ;;  %v2522_v63 = vsel %vm2293_vm3, %v6622_v31, 0.0  ;;  %2532 = vadd.xlane.f32.xlu1 %v2531_v49 }
 0x3d2   : > { %v2410_v53 = vsub.f32 %v6493_v21, %v2356_v37  ;;  %5367 = vpow2.f32 %v2464_v15  ;;  %2523 = vadd.xlane.f32.xlu0 %v2522_v63 }
 0x3d3   : > { %v6630_v33 = vpop.eup %5357  ;;  %v2468_v12 = vmul.f32 1.442695, %v2413_v55 }
 0x3d4   : > { %v2462_v17 = vmul.f32 1.442695, %v2410_v53  ;;  %v6632_v43 = vpop.eup %5359  ;;  %v2362_v7 = vpop.xlane.xlu1 %2361  ;;  %v2528_v61 = vsel %vm2293_vm3, %v6630_v33, 0.0 }
 0x3d5   : > { %5369 = vpow2.f32 %v2468_v12  ;;  %v2412_v34 = vsub.f32 %v6504_v2, %v2362_v7  ;;  %v2368_v21 = vpop.xlane.xlu0 %2367  ;;  %v2537_v22 = vsel %vm2293_vm3, %v6632_v43, 0.0  ;;  %2529 = vadd.xlane.f32.xlu1 %v2528_v61 }
 0x3d6   : > { %5371 = vpow2.f32 %v2462_v17  ;;  %v2414_v0 = vsub.f32 %v6508_v54, %v2368_v21  ;;  %2538 = vadd.xlane.f32.xlu0 %v2537_v22 }
 0x3d7   : > { %v6640_v56 = vpop.eup %5361  ;;  %v2466_v3 = vmul.f32 1.442695, %v2412_v34 }
 0x3d8   : > { %v6642_v27 = vpop.eup %5363  ;;  %v2470_v13 = vmul.f32 1.442695, %v2414_v0  ;;  %v2543_v26 = vsel %vm2293_vm3, %v6640_v56, 0.0 }
 0x3d9   : > { %5373 = vpow2.f32 %v2466_v3  ;;  %v2371_v2 = vpop.xlane.xlu0 %2370  ;;  %v2534_v4 = vsel %vm2293_vm3, %v6642_v27, 0.0  ;;  %2544 = vadd.xlane.f32.xlu1 %v2543_v26  ;;  %v2374_v8 = vpop.xlane.xlu1 %2373 }
 0x3da   : > { %5375 = vpow2.f32 %v2470_v13  ;;  %v2415_v54 = vsub.f32 %v6516_v29, %v2371_v2  ;;  %2535 = vadd.xlane.f32.xlu0 %v2534_v4  ;;  %v2416_v20 = vsub.f32 %v6520_v42, %v2374_v8 }
 0x3db   : > { %v6650_v51 = vpop.eup %5365 }
 0x3dc   : > { %v6652_v35 = vpop.eup %5367  ;;  %v2472_v28 = vmul.f32 1.442695, %v2415_v54  ;;  %v2474_v11 = vmul.f32 1.442695, %v2416_v20  ;;  %v2540_v15 = vsel %vm2293_vm3, %v6650_v51, 0.0 }
 0x3dd   : > { %v2377_v45 = vpop.xlane.xlu0 %2376  ;;  %v2549_v37 = vsel %vm2293_vm3, %v6652_v35, 0.0  ;;  %2541 = vadd.xlane.f32.xlu1 %v2540_v15  ;;  %v2380_v49 = vpop.xlane.xlu1 %2379 }
 0x3de   : > { %5377 = vpow2.f32 %v2472_v28  ;;  %v2417_v29 = vsub.f32 %v6524_v52, %v2377_v45  ;;  %2550 = vadd.xlane.f32.xlu0 %v2549_v37  ;;  %v2418_v42 = vsub.f32 %v6532_v24, %v2380_v49 }
 0x3df   : > { %v6660_v55 = vpop.eup %5369  ;;  %5379 = vpow2.f32 %v2474_v11 }
 0x3e0   : > { %v6662_v53 = vpop.eup %5371  ;;  %v2476_v63 = vmul.f32 1.442695, %v2417_v29  ;;  %v2478_v12 = vmul.f32 1.442695, %v2418_v42  ;;  %v2555_v17 = vsel %vm2293_vm3, %v6660_v55, 0.0 }
 0x3e1   : > { %v2546_v7 = vsel %vm2293_vm3, %v6662_v53, 0.0  ;;  %v2383_v61 = vpop.xlane.xlu0 %2382  ;;  %2556 = vadd.xlane.f32.xlu1 %v2555_v17  ;;  %v2386_v34 = vpop.xlane.xlu1 %2385 }
 0x3e2   : > { %5381 = vpow2.f32 %v2476_v63  ;;  %2547 = vadd.xlane.f32.xlu0 %v2546_v7  ;;  %v2419_v52 = vsub.f32 %v6540_v6, %v2383_v61  ;;  %v2420_v24 = vsub.f32 %v6543_v10, %v2386_v34 }
 0x3e3   : > { %v6670_v21 = vpop.eup %5373  ;;  %5383 = vpow2.f32 %v2478_v12 }
 0x3e4   : > { %v6672_v22 = vpop.eup %5375  ;;  %v2480_v0 = vmul.f32 1.442695, %v2419_v52  ;;  %v2482_v3 = vmul.f32 1.442695, %v2420_v24  ;;  %v2552_v13 = vsel %vm2293_vm3, %v6670_v21, 0.0 }
 0x3e5   : > { %v2389_v26 = vpop.xlane.xlu0 %2388  ;;  %2553 = vadd.xlane.f32.xlu1 %v2552_v13  ;;  %v2558_v2 = vsel %vm2293_vm3, %v6672_v22, 0.0  ;;  %v2488_v4 = vpop.xlane.xlu1 %2487 }
 0x3e6   : > { %5385 = vpow2.f32 %v2480_v0  ;;  %v2421_v6 = vsub.f32 %v6551_v47, %v2389_v26  ;;  %2559 = vadd.xlane.f32.xlu0 %v2558_v2 }
 0x3e7   : > { %5387 = vpow2.f32 %v2482_v3 }
 0x3e8   : > { %v6679_v10 = vpop.eup %5377  ;;  %v2484_v8 = vmul.f32 1.442695, %v2421_v6  ;;  %5389 = vrcp.f32 %v2488_v4 }
 0x3e9   : > { %v6681_v54 = vpop.eup %5379  ;;  %v2491_v20 = vpop.xlane.xlu0 %2490  ;;  %v2561_v28 = vsel %vm2293_vm3, %v6679_v10, 0.0 }
 0x3ea   : > { %v2497_v11 = vpop.xlane.xlu1 %2496  ;;  %5391 = vpow2.f32 %v2484_v8  ;;  %2562 = vadd.xlane.f32.xlu0 %v2561_v28  ;;  %v2564_v15 = vsel %vm2293_vm3, %v6681_v54, 0.0 }
 0x3eb   : > { %5393 = vrcp.f32 %v2491_v20  ;;  %2565 = vadd.xlane.f32.xlu1 %v2564_v15 }
 0x3ec   : > { %v6687_v47 = vpop.eup %5381  ;;  %5395 = vrcp.f32 %v2497_v11 }
 0x3ed   : > { %v6689_v45 = vpop.eup %5383  ;;  %v2503_v37 = vpop.xlane.xlu0 %2502  ;;  %v2567_v49 = vsel %vm2293_vm3, %v6687_v47, 0.0 }
 0x3ee   : > { %v2494_v29 = vpop.xlane.xlu1 %2493  ;;  %2568 = vadd.xlane.f32.xlu0 %v2567_v49  ;;  %v2570_v42 = vsel %vm2293_vm3, %v6689_v45, 0.0 }
 0x3ef   : > { %5397 = vrcp.f32 %v2494_v29  ;;  %2571 = vadd.xlane.f32.xlu1 %v2570_v42 }
 0x3f0   : > { %v6695_v63 = vpop.eup %5385  ;;  %5399 = vrcp.f32 %v2503_v37 }
 0x3f1   : > { %v6697_v12 = vpop.eup %5387  ;;  %v2500_v17 = vpop.xlane.xlu0 %2499  ;;  %v2573_v7 = vsel %vm2293_vm3, %v6695_v63, 0.0 }
 0x3f2   : > { %v2509_v61 = vpop.xlane.xlu1 %2508  ;;  %v5390_v34 = vpop.eup %5389  ;;  %5401 = vrcp.f32 %v2500_v17  ;;  %2574 = vadd.xlane.f32.xlu0 %v2573_v7  ;;  %v2576_v52 = vsel %vm2293_vm3, %v6697_v12, 0.0 }
 0x3f3   : > { %2577 = vadd.xlane.f32.xlu1 %v2576_v52  ;;  %v2614_v24 = vmul.f32 %v5390_v34, %v6553_v39  ;;  %5403 = vrcp.f32 %v2509_v61 }
 0x3f4   : > { %v6704_v0 = vpop.eup %5391 }
 0x3f5   : > { %v5394_v3 = vpop.eup %5393  ;;  %4855 = vmatprep.mubr.msk.f32.mxu0 %vm2293_vm3, %v2614_v24  ;;  %v2579_v13 = vsel %vm2293_vm3, %v6704_v0, 0.0 }
 0x3f6   : > { %v2506_v26 = vpop.xlane.xlu1 %2505  ;;  %v2615_v2 = vmul.f32 %v5394_v3, %v6555_v40  ;;  %2580 = vadd.xlane.f32.xlu0 %v2579_v13  ;;  %v5396_v4 = vpop.eup %5395 }
 0x3f7   : > { %5405 = vrcp.f32 %v2506_v26  ;;  %v2617_v20 = vmul.f32 %v5396_v4, %v6561_v9 }
 0x3f8   : > { %4856 = vmatmul.mubr.msk.f32.vlgmr.msra.gmra.mrb[20].mxu0 %vm2293_vm3, %v2615_v2 }
 0x3f9   : > { %v5398_v6 = vpop.eup %5397  ;;  %5106 = vmatpush3.bf16.msra.mxu0 %v6186_v62 }
 0x3fa   : > { %5112 = vmatprep.subr.bf16.mxu0 %v6239_v16  ;;  %v2616_v39 = vmul.f32 %v5398_v6, %v6563_v60  ;;  %v5400_v8 = vpop.eup %5399 }
 0x3fb   : > { %v2619_v11 = vmul.f32 %v5400_v8, %v6569_v25 }
 0x3fc   : > { %v5402_v28 = vpop.eup %5401  ;;  %4862 = vmatprep.mubr.msk.f32.mxu1 %vm2293_vm3, %v2616_v39 }
 0x3fd   : > { %4863 = vmatmul.mubr.msk.f32.vlgmr.msra.gmra.mrb[28].mxu1 %vm2293_vm3, %v2617_v20  ;;  %v2618_v40 = vmul.f32 %v5402_v28, %v6577_v1  ;;  %v5404_v15 = vpop.eup %5403 }
 0x3fe   : > { %5110 = vmatpush3.bf16.msra.mxu1 %v6200_v5  ;;  %v2621_v60 = vmul.f32 %v5404_v15, %v6571_v57 }
 0x3ff   : > { %5116 = vmatprep.subr.bf16.mxu1 %v6247_v23  ;;  %4869 = vmatprep.mubr.msk.f32.mxu0 %vm2293_vm3, %v2618_v40 }
 0x400   : > { %4870 = vmatmul.mubr.msk.f32.vlgmr.msra.gmra.mrb[22].mxu0 %vm2293_vm3, %v2619_v11 }
 0x401   : > { %v5406_v62 = vpop.eup %5405  ;;  %5114 = vmatpush3.bf16.msra.mxu0 %v6239_v16 }
 0x402   : > { %v2620_v9 = vmul.f32 %v5406_v62, %v6583_v14  ;;  %5120 = vmatprep.subr.bf16.mxu0 %v6257_v30 }
 0x404   : > { %4876 = vmatprep.mubr.msk.f32.mxu1 %vm2293_vm3, %v2620_v9  ;;  %v6983_v9 = vld [vmem:[#allocation23_spill] sm:$0xff] }
 0x405   : > { %4877 = vmatmul.mubr.msk.f32.vlgmr.msra.gmra.mrb[30].mxu1 %vm2293_vm3, %v2621_v60 }
 0x406   : > { %5118 = vmatpush3.bf16.msra.mxu1 %v6247_v23 }
 0x407   : > { %5124 = vmatprep.subr.bf16.mxu1 %v6267_v38 }
 0x44d   : > { %v2515_v5 = vpop.xlane.xlu0 %2514 }
 0x44e   : > { %5407 = vrcp.f32 %v2515_v5 }
 0x451   : > { %v2512_v25 = vpop.xlane.xlu0 %2511 }
 0x452   : > { %5409 = vrcp.f32 %v2512_v25 }
 0x455   : > { %v2521_v1 = vpop.xlane.xlu1 %2520 }
 0x456   : > { %5411 = vrcp.f32 %v2521_v1 }
 0x458   : > { %v5408_v57 = vpop.eup %5407 }
 0x459   : > { %v2518_v16 = vpop.xlane.xlu1 %2517  ;;  %v2623_v29 = vmul.f32 %v5408_v57, %v6592_v50  ;;  %v6984_v57 = vld [vmem:[#allocation24_spill] sm:$0xff] }
 0x45a   : > { %v2527_v14 = vpop.xlane.xlu0 %2526  ;;  %5413 = vrcp.f32 %v2518_v16 }
 0x45b   : > { %5415 = vrcp.f32 %v2527_v14 }
 0x45c   : > { %v5410_v37 = vpop.eup %5409 }
 0x45d   : > { %v2622_v49 = vmul.f32 %v5410_v37, %v6598_v36 }
 0x45e   : > { %v2533_v42 = vpop.xlane.xlu1 %2532 }
 0x45f   : > { %v2524_v23 = vpop.xlane.xlu0 %2523  ;;  %4883 = vmatprep.mubr.msk.f32.mxu0 %vm2293_vm3, %v2622_v49 }
 0x460   : > { %5417 = vrcp.f32 %v2524_v23  ;;  %4884 = vmatmul.mubr.msk.f32.vlgmr.msra.gmra.mrb[24].mxu0 %vm2293_vm3, %v2623_v29  ;;  %v5412_v7 = vpop.eup %5411 }
 0x461   : > { %5122 = vmatpush3.bf16.msra.mxu0 %v6257_v30  ;;  %5419 = vrcp.f32 %v2533_v42  ;;  %v2625_v34 = vmul.f32 %v5412_v7, %v6604_v19 }
 0x462   : > { %5128 = vmatprep.subr.bf16.mxu0 %v6259_v32  ;;  %v2530_v17 = vpop.xlane.xlu1 %2529 }
 0x463   : > { %v2539_v61 = vpop.xlane.xlu0 %2538  ;;  %5421 = vrcp.f32 %v2530_v17 }
 0x464   : > { %v5414_v36 = vpop.eup %5413  ;;  %5423 = vrcp.f32 %v2539_v61 }
 0x465   : > { %v2624_v50 = vmul.f32 %v5414_v36, %v6610_v46  ;;  %v5416_v30 = vpop.eup %5415 }
 0x466   : > { %v2545_v52 = vpop.xlane.xlu1 %2544  ;;  %v2627_v2 = vmul.f32 %v5416_v30, %v6612_v18 }
 0x467   : > { %v2536_v24 = vpop.xlane.xlu0 %2535  ;;  %4890 = vmatprep.mubr.msk.f32.mxu1 %vm2293_vm3, %v2624_v50 }
 0x468   : > { %5425 = vrcp.f32 %v2536_v24  ;;  %4891 = vmatmul.mubr.msk.f32.vlgmr.msra.gmra.mrb[32].mxu1 %vm2293_vm3, %v2625_v34 }
 0x469   : > { %5126 = vmatpush3.bf16.msra.mxu1 %v6267_v38  ;;  %5427 = vrcp.f32 %v2545_v52 }
 0x46a   : > { %v5418_v3 = vpop.eup %5417  ;;  %5132 = vmatprep.subr.bf16.mxu1 %v6273_v41  ;;  %v2542_v13 = vpop.xlane.xlu1 %2541 }
 0x46b   : > { %v2551_v26 = vpop.xlane.xlu0 %2550  ;;  %5429 = vrcp.f32 %v2542_v13  ;;  %v2626_v19 = vmul.f32 %v5418_v3, %v6622_v31  ;;  %v5420_v46 = vpop.eup %5419 }
 0x46c   : > { %v2629_v39 = vmul.f32 %v5420_v46, %v6620_v44  ;;  %5431 = vrcp.f32 %v2551_v26 }
 0x46d   : > { %v5422_v4 = vpop.eup %5421  ;;  %4897 = vmatprep.mubr.msk.f32.mxu0 %vm2293_vm3, %v2626_v19 }
 0x46e   : > { %4898 = vmatmul.mubr.msk.f32.vlgmr.msra.gmra.mrb[26].mxu0 %vm2293_vm3, %v2627_v2  ;;  %v2557_v6 = vpop.xlane.xlu1 %2556  ;;  %v2628_v38 = vmul.f32 %v5422_v4, %v6630_v33  ;;  %v5424_v18 = vpop.eup %5423 }
 0x46f   : > { %5130 = vmatpush3.bf16.msra.mxu0 %v6259_v32  ;;  %v2548_v8 = vpop.xlane.xlu0 %2547  ;;  %v2631_v28 = vmul.f32 %v5424_v18, %v6632_v43 }
 0x470   : > { %5433 = vrcp.f32 %v2548_v8  ;;  %5136 = vmatprep.subr.bf16.mxu0 %v6285_v48  ;;  %4904 = vmatprep.mubr.msk.f32.mxu1 %vm2293_vm3, %v2628_v38  ;;  %v4064_v38 = vld [vmem:[#allocation8 + $0x8] sm:$0xff] }
 0x471   : > { %4905 = vmatmul.mubr.msk.f32.vlgmr.msra.gmra.mrb[34].mxu1 %vm2293_vm3, %v2629_v39  ;;  %5435 = vrcp.f32 %v2557_v6  ;;  %v4063_v6 = vld [vmem:[#allocation8] sm:$0xff] }
 0x472   : > { %v5426_v31 = vpop.eup %5425  ;;  %5134 = vmatpush3.bf16.msra.mxu1 %v6273_v41  ;;  %v2554_v20 = vpop.xlane.xlu1 %2553  ;;  %v5159_v8 = vpack.c.bf16 %v4064_v38, %v4063_v6 }
 0x473   : > { %5140 = vmatprep.subr.bf16.mxu1 %v6307_v59  ;;  %5437 = vrcp.f32 %v2554_v20  ;;  %v2560_v44 = vpop.xlane.xlu0 %2559  ;;  %v2630_v32 = vmul.f32 %v5426_v31, %v6642_v27  ;;  %v5428_v33 = vpop.eup %5427  ;;  %v4065_v20 = vld [vmem:[#allocation8 + $0x10] sm:$0xff] }
 0x474   : > { %5439 = vrcp.f32 %v2560_v44  ;;  %v2633_v41 = vmul.f32 %v5428_v33, %v6640_v56  ;;  %v4066_v44 = vld [vmem:[#allocation8 + $0x18] sm:$0xff] }
 0x475   : > { %v5430_v40 = vpop.eup %5429  ;;  %4911 = vmatprep.mubr.msk.f32.mxu0 %vm2293_vm3, %v2630_v32  ;;  %v5163_v33 = vpack.c.bf16 %v4066_v44, %v4065_v20  ;;  %v4512_v44 = vld [vmem:[%s6929_s5] ss:$0 sm:$0xff] }
 0x476   : > { %4912 = vmatmul.mubr.msk.f32.vlgmr.msra.gmra.mrb[28].mxu0 %vm2293_vm3, %v2631_v28  ;;  %v2632_v11 = vmul.f32 %v5430_v40, %v6650_v51  ;;  %v5432_v43 = vpop.eup %5431 }
 0x477   : > { %5138 = vmatpush3.bf16.msra.mxu0 %v6285_v48  ;;  %v2563_v15 = vpop.xlane.xlu0 %2562  ;;  %v2635_v60 = vmul.f32 %v5432_v43, %v6652_v35 }
 0x478   : > { %5144 = vmatprep.subr.bf16.mxu0 %v6301_v58  ;;  %5441 = vrcp.f32 %v2563_v15  ;;  %4918 = vmatprep.mubr.msk.f32.mxu1 %vm2293_vm3, %v2632_v11  ;;  %v2566_v27 = vpop.xlane.xlu1 %2565 }
 0x479   : > { %5443 = vrcp.f32 %v2566_v27  ;;  %4919 = vmatmul.mubr.msk.f32.vlgmr.msra.gmra.mrb[36].mxu1 %vm2293_vm3, %v2633_v41 }
 0x47a   : > { %v5434_v62 = vpop.eup %5433  ;;  %5142 = vmatpush3.bf16.msra.mxu1 %v6307_v59 }
 0x47b   : > { %5148 = vmatprep.subr.bf16.mxu1 %v6983_v9  ;;  %v2569_v51 = vpop.xlane.xlu0 %2568  ;;  %v2634_v56 = vmul.f32 %v5434_v62, %v6662_v53  ;;  %v5436_v48 = vpop.eup %5435 }
 0x47c   : > { %5445 = vrcp.f32 %v2569_v51  ;;  %v2572_v5 = vpop.xlane.xlu1 %2571  ;;  %v2637_v59 = vmul.f32 %v5436_v48, %v6660_v55 }
 0x47d   : > { %v5438_v25 = vpop.eup %5437  ;;  %4925 = vmatprep.mubr.msk.f32.mxu0 %vm2293_vm3, %v2634_v56  ;;  %5447 = vrcp.f32 %v2572_v5 }
 0x47e   : > { %v5440_v1 = vpop.eup %5439  ;;  %4926 = vmatmul.mubr.msk.f32.vlgmr.msra.gmra.mrb[30].mxu0 %vm2293_vm3, %v2635_v60  ;;  %v2636_v16 = vmul.f32 %v5438_v25, %v6670_v21  ;;  %v6985_v21 = vld [vmem:[#allocation25_spill] sm:$0xff] }
 0x47f   : > { %5146 = vmatpush3.bf16.msra.mxu0 %v6301_v58  ;;  %v2575_v14 = vpop.xlane.xlu0 %2574  ;;  %v2638_v53 = vmul.f32 %v5440_v1, %v6672_v22 }
 0x480   : > { %5152 = vmatprep.subr.bf16.mxu0 %v6984_v57  ;;  %5449 = vrcp.f32 %v2575_v14  ;;  %4932 = vmatprep.mubr.msk.f32.mxu1 %vm2293_vm3, %v2636_v16  ;;  %v2578_v35 = vpop.xlane.xlu1 %2577 }
 0x481   : > { %5451 = vrcp.f32 %v2578_v35  ;;  %4933 = vmatmul.mubr.msk.f32.vlgmr.msra.gmra.mrb[38].mxu1 %vm2293_vm3, %v2637_v59  ;;  %4939 = vmatprep.mubr.msk.f32.mxu0 %vm2293_vm3, %v2638_v53 }
 0x482   : > { %v5442_v37 = vpop.eup %5441  ;;  %5150 = vmatpush3.bf16.msra.mxu1 %v6983_v9 }
 0x483   : > { %v5444_v55 = vpop.eup %5443  ;;  %v2639_v58 = vmul.f32 %v5442_v37, %v6679_v10  ;;  %5156 = vmatprep.subr.bf16.mxu1 %v6985_v21  ;;  %v2581_v22 = vpop.xlane.xlu0 %2580 }
 0x484   : > { %5453 = vrcp.f32 %v2581_v22  ;;  %v2640_v49 = vmul.f32 %v5444_v55, %v6681_v54 }
 0x485   : > { %4940 = vmatmul.mubr.msk.f32.vlgmr.msra.gmra.mrb[32].mxu0 %vm2293_vm3, %v2639_v58 }
 0x486   : > { %v5446_v29 = vpop.eup %5445  ;;  %5154 = vmatpush3.bf16.msra.mxu0 %v6984_v57  ;;  %4946 = vmatprep.mubr.msk.f32.mxu1 %vm2293_vm3, %v2640_v49 }
 0x487   : > { %v5448_v42 = vpop.eup %5447  ;;  %v2641_v23 = vmul.f32 %v5446_v29, %v6687_v47  ;;  %5160 = vmatprep.subr.bf16.mxu0 %v5159_v8 }
 0x488   : > { %v2642_v17 = vmul.f32 %v5448_v42, %v6689_v45 }
 0x489   : > { %4947 = vmatmul.mubr.msk.f32.vlgmr.msra.gmra.mrb[40].mxu1 %vm2293_vm3, %v2641_v23 }
 0x48a   : > { %v5450_v10 = vpop.eup %5449  ;;  %5158 = vmatpush3.bf16.msra.mxu1 %v6985_v21  ;;  %4953 = vmatprep.mubr.msk.f32.mxu0 %vm2293_vm3, %v2642_v17 }
 0x48b   : > { %v5452_v54 = vpop.eup %5451  ;;  %v2643_v7 = vmul.f32 %v5450_v10, %v6695_v63 }
 0x48c   : > { %v2644_v61 = vmul.f32 %v5452_v54, %v6697_v12 }
 0x48d   : > { %4954 = vmatmul.mubr.msk.f32.vlgmr.msra.gmra.mrb[34].mxu0 %vm2293_vm3, %v2643_v7 }
 0x48e   : > { %v5454_v36 = vpop.eup %5453  ;;  %4960 = vmatprep.mubr.msk.f32.mxu1 %vm2293_vm3, %v2644_v61  ;;  %5162 = vmatpush3.bf16.msra.mxu0 %v5159_v8 }
 0x48f   : > { %v2645_v47 = vmul.f32 %v5454_v36, %v6704_v0  ;;  %5164 = vmatprep.subr.bf16.mxu0 %v5163_v33 }
 0x491   : > { %4961 = vmatmul.mubr.msk.f32.vlgmr.msra.gmra.mrb[42].mxu1 %vm2293_vm3, %v2645_v47 }
 0x492   : > { %5166 = vmatpush3.bf16.msra.mxu0 %v5163_v33 }
 0x4cb   : > { %v6797_v45 = vpop.f32.mrb[20].mxu0 }
 0x4cc   : > { %v6799_v50 = vpop.f32.mrb[21].mxu0 }
 0x4d0   : > { %v6801_v34 = vpop.f32.mrb[28].mxu1 }
 0x4d1   : > { %v6803_v52 = vpop.f32.mrb[29].mxu1 }
 0x4d3   : > { %v6805_v63 = vpop.f32.mrb[22].mxu0 }
 0x4d4   : > { %v6807_v12 = vpop.f32.mrb[23].mxu0 }
 0x4d8   : > { %v6809_v24 = vpop.f32.mrb[30].mxu1 }
 0x4d9   : > { %v6811_v30 = vpop.f32.mrb[31].mxu1 }
 0x533   : > { %v4885_v3 = vpop.f32.mrb[24].mxu0 }
 0x534   : > { %3952 = vrot.lane.b32.xlu0 %v4885_v3, %s5724_s20  ;;  %v3042_v0 = vpop.f32.mrb[25].mxu0 }
 0x535   : > { %3950 = vrot.lane.b32.xlu1 %v3042_v0, %s5724_s20 }
 0x53b   : > { %v4892_v13 = vpop.f32.mrb[32].mxu1 }
 0x53c   : > { %3956 = vrot.lane.b32.xlu1 %v4892_v13, %s5724_s20  ;;  %v3123_v26 = vpop.f32.mrb[33].mxu1 }
 0x53d   : > { %3954 = vrot.lane.b32.xlu0 %v3123_v26, %s5724_s20 }
 0x541   : > { %v4899_v19 = vpop.f32.mrb[26].mxu0 }
 0x542   : > { %v3204_v46 = vpop.f32.mrb[27].mxu0  ;;  %3960 = vrot.lane.b32.xlu1 %v4899_v19, %s5724_s20 }
 0x543   : > { %3958 = vrot.lane.b32.xlu0 %v3204_v46, %s5724_s20 }
 0x544   : > { %v4906_v2 = vpop.f32.mrb[34].mxu1 }
 0x545   : > { %v3285_v4 = vpop.f32.mrb[35].mxu1 }
 0x546   : > { %3964 = vrot.lane.b32.xlu1 %v4906_v2, %s5724_s20 }
 0x547   : > { %3962 = vrot.lane.b32.xlu0 %v3285_v4, %s5724_s20 }
 0x549   : > { %v4913_v39 = vpop.f32.mrb[28].mxu0 }
 0x54a   : > { %v3366_v18 = vpop.f32.mrb[29].mxu0  ;;  %3984 = vrot.lane.b32.xlu1 %v4913_v39, %s5725_s18 }
 0x54c   : > { %v4920_v31 = vpop.f32.mrb[36].mxu1 }
 0x54d   : > { %v3447_v32 = vpop.f32.mrb[37].mxu1 }
 0x54e   : > { %3982 = vrot.lane.b32.xlu1 %v3366_v18, %s5725_s18  ;;  %3986 = vrot.lane.b32.xlu0 %v3447_v32, %s5725_s18 }
 0x551   : > { %v4927_v28 = vpop.f32.mrb[30].mxu0 }
 0x552   : > { %v3528_v40 = vpop.f32.mrb[31].mxu0  ;;  %3988 = vrot.lane.b32.xlu1 %v4920_v31, %s5725_s18 }
 0x553   : > { %3990 = vrot.lane.b32.xlu0 %v3528_v40, %s5725_s18 }
 0x554   : > { %v4934_v11 = vpop.f32.mrb[38].mxu1 }
 0x555   : > { %v3609_v41 = vpop.f32.mrb[39].mxu1 }
 0x556   : > { %3992 = vrot.lane.b32.xlu1 %v4927_v28, %s5725_s18 }
 0x557   : > { %3994 = vrot.lane.b32.xlu0 %v3609_v41, %s5725_s18 }
 0x558   : > { %v4941_v15 = vpop.f32.mrb[32].mxu0 }
 0x559   : > { %v3690_v27 = vpop.f32.mrb[33].mxu0 }
 0x55a   : > { %3996 = vrot.lane.b32.xlu1 %v4934_v11, %s5725_s18 }
 0x55b   : > { %4014 = vrot.lane.b32.xlu0 %v3690_v27, %s5726_s25 }
 0x55c   : > { %v4948_v43 = vpop.f32.mrb[40].mxu1 }
 0x55d   : > { %v3771_v62 = vpop.f32.mrb[41].mxu1 }
 0x55e   : > { %4016 = vrot.lane.b32.xlu1 %v4941_v15, %s5726_s25 }
 0x55f   : > { %4018 = vrot.lane.b32.xlu0 %v3771_v62, %s5726_s25 }
 0x560   : > { %v4955_v9 = vpop.f32.mrb[34].mxu0 }
 0x561   : > { %v3852_v51 = vpop.f32.mrb[35].mxu0 }
 0x562   : > { %4020 = vrot.lane.b32.xlu1 %v4948_v43, %s5726_s25 }
 0x563   : > { %4022 = vrot.lane.b32.xlu0 %v3852_v51, %s5726_s25 }
 0x564   : > { %v4962_v56 = vpop.f32.mrb[42].mxu1 }
 0x565   : > { %v3933_v48 = vpop.f32.mrb[43].mxu1 }
 0x566   : > { %4024 = vrot.lane.b32.xlu1 %v4955_v9, %s5726_s25 }
 0x567   : > { %4026 = vrot.lane.b32.xlu0 %v3933_v48, %s5726_s25 }
 0x56a   : > { %4028 = vrot.lane.b32.xlu1 %v4962_v56, %s5726_s25 }
 0x5a6   : > { %v3953_v5 = vpop.permute.xlu0 %3952 }
 0x5a7   : > { %v3951_v60 = vpop.permute.xlu1 %3950  ;;  %v4039_v10 = vsel %vm884_vm1, %v6797_v45, %v3953_v5 }
 0x5a8   : > { %v4038_v49 = vsel %vm884_vm1, %v6799_v50, %v3951_v60 }
 0x5ae   : > { %v3957_v25 = vpop.permute.xlu1 %3956 }
 0x5af   : > { %v3955_v1 = vpop.permute.xlu0 %3954  ;;  %v4041_v45 = vsel %vm884_vm1, %v6801_v34, %v3957_v25 }
 0x5b0   : > { %v4040_v54 = vsel %vm884_vm1, %v6803_v52, %v3955_v1 }
 0x5b4   : > { %v3961_v16 = vpop.permute.xlu1 %3960 }
 0x5b5   : > { %v3959_v59 = vpop.permute.xlu0 %3958  ;;  %v4043_v34 = vsel %vm884_vm1, %v6805_v63, %v3961_v16 }
 0x5b6   : > { %v4042_v52 = vsel %vm884_vm1, %v6807_v12, %v3959_v59 }
 0x5b8   : > { %v3965_v14 = vpop.permute.xlu1 %3964 }
 0x5b9   : > { %v3963_v53 = vpop.permute.xlu0 %3962  ;;  %v4045_v63 = vsel %vm884_vm1, %v6809_v24, %v3965_v14 }
 0x5ba   : > { %v4044_v12 = vsel %vm884_vm1, %v6811_v30, %v3963_v53 }
 0x5bc   : > { %v3985_v57 = vpop.permute.xlu1 %3984 }
 0x5bd   : > { %v4047_v7 = vsel %vm2293_vm3, %v4039_v10, %v3985_v57 }
 0x5c0   : > { %v3983_v35 = vpop.permute.xlu1 %3982  ;;  %v3987_v37 = vpop.permute.xlu0 %3986 }
 0x5c1   : > { %v4046_v42 = vsel %vm2293_vm3, %v4038_v49, %v3983_v35  ;;  %v4048_v36 = vsel %vm2293_vm3, %v4040_v54, %v3987_v37 }
 0x5c4   : > { %v3989_v55 = vpop.permute.xlu1 %3988 }
 0x5c5   : > { %v3991_v58 = vpop.permute.xlu0 %3990  ;;  %v4049_v0 = vsel %vm2293_vm3, %v4041_v45, %v3989_v55 }
 0x5c6   : > { %v4050_v26 = vsel %vm2293_vm3, %v4042_v52, %v3991_v58 }
 0x5c8   : > { %v3993_v21 = vpop.permute.xlu1 %3992 }
 0x5c9   : > { %v3995_v22 = vpop.permute.xlu0 %3994  ;;  %v4051_v4 = vsel %vm2293_vm3, %v4043_v34, %v3993_v21 }
 0x5ca   : > { %v4052_v38 = vsel %vm2293_vm3, %v4044_v12, %v3995_v22 }
 0x5cc   : > { %v3997_v29 = vpop.permute.xlu1 %3996 }
 0x5cd   : > { %v4015_v23 = vpop.permute.xlu0 %4014  ;;  %v4053_v30 = vsel %vm2293_vm3, %v4045_v63, %v3997_v29 }
 0x5ce   : > { %v4055_v17 = vsel %vm4054_vm4, %v4046_v42, %v4015_v23 }
 0x5cf   : > { %4971 = vmatprep.mubr.msk.f32.mxu0 %vm481_vm0, %v4055_v17 }
 0x5d0   : > { %v4017_v61 = vpop.permute.xlu1 %4016 }
 0x5d1   : > { %v4056_v47 = vsel %vm4054_vm4, %v4047_v7, %v4017_v61  ;;  %v4019_v50 = vpop.permute.xlu0 %4018 }
 0x5d2   : > { %v4057_v3 = vsel %vm4054_vm4, %v4048_v36, %v4019_v50  ;;  %4972 = vmatmul.mubr.msk.f32.vlgmr.msra.gmra.mrb[36].mxu0 %vm481_vm0, %v4056_v47 }
 0x5d3   : > { %4974 = vmatprep.mubr.msk.f32.mxu0 %vm481_vm0, %v4057_v3 }
 0x5d4   : > { %v4021_v13 = vpop.permute.xlu1 %4020 }
 0x5d5   : > { %v4058_v19 = vsel %vm4054_vm4, %v4049_v0, %v4021_v13  ;;  %v4023_v46 = vpop.permute.xlu0 %4022 }
 0x5d6   : > { %v4059_v2 = vsel %vm4054_vm4, %v4050_v26, %v4023_v46  ;;  %4975 = vmatmul.mubr.msk.f32.gmra.mrb[38].mxu0 %vm481_vm0, %v4058_v19 }
 0x5d7   : > { %4977 = vmatprep.mubr.msk.f32.mxu0 %vm481_vm0, %v4059_v2 }
 0x5d8   : > { %v4025_v6 = vpop.permute.xlu1 %4024 }
 0x5d9   : > { %v4060_v39 = vsel %vm4054_vm4, %v4051_v4, %v4025_v6  ;;  %v4027_v8 = vpop.permute.xlu0 %4026 }
 0x5da   : > { %v4061_v18 = vsel %vm4054_vm4, %v4052_v38, %v4027_v8  ;;  %4978 = vmatmul.mubr.msk.f32.gmra.mrb[40].mxu0 %vm481_vm0, %v4060_v39 }
 0x5db   : > { %4980 = vmatprep.mubr.msk.f32.mxu0 %vm481_vm0, %v4061_v18 }
 0x5dc   : > { %v4029_v31 = vpop.permute.xlu1 %4028 }
 0x5dd   : > { %v4062_v20 = vsel %vm4054_vm4, %v4053_v30, %v4029_v31 }
 0x5de   : > { %4981 = vmatmul.mubr.msk.f32.gmra.mrb[42].mxu0 %vm481_vm0, %v4062_v20 }
 0x6a5   : > { %v4973_v32 = vpop.f32.mrb[36].mxu0 }
 0x6a6   : > { %v4170_v33 = vadd.f32 %v4973_v32, %v4512_v44  ;;  %v4164_v28 = vpop.f32.mrb[37].mxu0 }
 0x6a7   : > { %v4165_v40 = vadd.f32 %v4512_v44, %v4164_v28 }
 0x6a8   : > { %4204 = vst.msk [vmem:[%s449_s14 + $0x8] sm:$0xff] %vm481_vm0, %v4170_v33 }
 0x6a9   : > { %4203 = vst.msk [vmem:[%s449_s14] sm:$0xff] %vm481_vm0, %v4165_v40  ;;  %v4976_v24 = vpop.f32.mrb[38].mxu0 }
 0x6aa   : > { %v4180_v11 = vadd.f32 %v4976_v24, %v4512_v44  ;;  %v4174_v41 = vpop.f32.mrb[39].mxu0 }
 0x6ab   : > { %v4175_v15 = vadd.f32 %v4512_v44, %v4174_v41 }
 0x6ac   : > { %4206 = vst.msk [vmem:[%s449_s14 + $0x18] sm:$0xff] %vm481_vm0, %v4180_v11 }
 0x6ad   : > { %4205 = vst.msk [vmem:[%s449_s14 + $0x10] sm:$0xff] %vm481_vm0, %v4175_v15  ;;  %v4979_v27 = vpop.f32.mrb[40].mxu0 }
 0x6ae   : > { %v4190_v43 = vadd.f32 %v4979_v27, %v4512_v44  ;;  %v4184_v62 = vpop.f32.mrb[41].mxu0 }
 0x6af   : > { %v4185_v9 = vadd.f32 %v4512_v44, %v4184_v62 }
 0x6b0   : > { %4208 = vst.msk [vmem:[%s449_s14 + $0x28] sm:$0xff] %vm481_vm0, %v4190_v43 }
 0x6b1   : > { %4207 = vst.msk [vmem:[%s449_s14 + $0x20] sm:$0xff] %vm481_vm0, %v4185_v9  ;;  %v4982_v51 = vpop.f32.mrb[42].mxu0 }
 0x6b2   : > { %v4200_v56 = vadd.f32 %v4982_v51, %v4512_v44  ;;  %v4194_v48 = vpop.f32.mrb[43].mxu0 }
 0x6b3   : > { %v4195_v60 = vadd.f32 %v4512_v44, %v4194_v48 }
 0x6b4   : > { %4210 = vst.msk [vmem:[%s449_s14 + $0x38] sm:$0xff] %vm481_vm0, %v4200_v56 }
 0x6b5   : > { %4209 = vst.msk [vmem:[%s449_s14 + $0x30] sm:$0xff] %vm481_vm0, %v4195_v60 }
 0x6b6   : > { %5642 = shalt.err (!%p5639_p7)
}
 0x6b7   : > { %s5643_s0 = scalar_lea.hbm %s6875_s24, 1024  ;;  %s5647_s2 = scalar_lea.hbm %s6932_s8, 2048 }
 0x6b8   : > { %p5644_p9 = scmp.ne.s32.totalorder %s6875_s24, %s5643_s0  ;;  %p5648_p12 = scmp.lt.u32.totalorder %s6875_s24, %s6932_s8 }
 0x6b9   : > { %p5649_p1 = scmp.lt.u32.totalorder %s5647_s2, %s5643_s0  ;;  %p5651_p5 = scmp.lt.u32.totalorder %s5643_s0, %s6875_s24 }
 0x6ba   : > { %p5645_p10 = pnand %p5644_p9, %p6986_p0 }
 0x6bb   : > { %p5650_p2 = por %p5649_p1, %p5648_p12 }
 0x6bc   : > { %p5646_p11 = pneg %p5645_p10 }
 0x6bd   : > { %p5652_p8 = por %p5651_p5, %p5650_p2 }
 0x6bf   : > { %p5653_p13 = pnand %p5652_p8, %p5646_p11 }
 0x6c1   : > { %5656 = shalt.err (!%p5653_p13)
}
 0x6c2   : > { %s5728_s22 = smov 128  }
 0x6c3   : > { %5189 = dma.vmem_to_hbm [thread:$0]  (%p6986_p0), %s6877_s17, 1024, %s6875_s24, %s4212_s9, %s5728_s22, %s5728_s22, %s5724_s20  }
 0x6c4 PF: > { %s6987_s12 = sld [smem:[#allocation20_spill]]  ;;  %s6988_s14 = sld [smem:[#allocation21_spill]] }
 0x6c5   : > { %p6990_p6 = scmp.ge.s32.totalorder %s5711_s30, 2 }
 0x6ca   : > { %s4241_s27 = sand.u32 1, %s6987_s12   ;;  %p6989_p4 = scmp.ne.s32.totalorder %s6988_s14, 0 }
 0x6cb   : > { %s4242_s6 = scalar_lea.sflag [#allocation4], %s4241_s27 }
 0x6cc   : > { %p5212_p3 = pnand %p6990_p6, %p6989_p4 }
 0x6ce   : > { %5694 = dma.done.wait (!%p5212_p3), %s4242_s6, 1024  }
 0x6cf   : > { %5696 = vsyncadd (!%p5212_p3), %s4242_s6, 4294966272  ;;  %s6991_s23 = sld [smem:[#allocation22_spill]]  ;;  %p28_p7 = scmp.ge.s32.totalorder %s5914_s26, 4  }
 0x6d0   : > { %s6992_s27 = smov %s5703_s28  ;;  %s6993_s28 = smov %s5707_s29 }
 0x6d1   : > { %s6995_s30 = smov %s5914_s26  ;;  %30 = sbr.rel (!%p28_p7) target bundleno = 15 (0xf), region = 135 }
 0x6d5   : > { %s6994_s29 = smov %s6991_s23 }
 0x6d8   :  { %4247 = vsyncpa [#allocation3], 1 }
 0x6d9   :  { %4249 = vsyncpa [#allocation3 + $0x1], 1 }
 0x6da   :  { %4250 = vsyncpa [#allocation6], 1 }
 0x6db   :  { %4252 = vsyncpa [#allocation6 + $0x1], 1 }
 0x6dc   :  { %4253 = vsyncpa [#allocation9], 1 }
 0x6dd   :  { %4254 = vsyncpa [#allocation12], 1 }
 0x6de   :  { %4256 = vsyncpa [#allocation12 + $0x1], 1 }
 0x6df   :  { %4257 = vsyncpa [#allocation4], 1 }
 0x6e0   :  { %4259 = vsyncpa [#allocation4 + $0x1], 1 }

</bundles_post_ra>
